<compile_context>
chip_gen: v6e
topology: v6e:2x2x1
jax: 0.10.0
libtpu: 0.0.40
codegen_flags: <defaults>
</compile_context>

<pallas_src>
import functools

import jax
import jax.numpy as jnp
from jax.experimental import pallas as pl
from jax.experimental.pallas import tpu as pltpu

HIST_LEN = 300
HIST_PAD = 384  # next multiple of 128 -> lane-dense input/output tiles
EMBED_DIM = 128


def _round_up(x, m):
    return (x + m - 1) // m * m


def _zipper_kernel(
    x_ref,
    w1_ref, b1_ref,
    w2_ref, b2_ref,
    w3_ref, b3_ref,
    w4_ref, b4_ref,
    w5_ref, b5_ref,
    w6_ref, b6_ref,
    out_ref,
):
    """Fused forward: zip (3x Linear+ReLU) then unzip (2x Linear+ReLU, 1 Linear).

    Weights are (in, out) so each layer is `h @ W + b` on the MXU.  Matmuls run
    in the weights' dtype (bf16 by default) with f32 accumulation; bias add and
    ReLU happen in f32 on the VPU (free under the MXU), then the activation is
    cast back for the next matmul.
    """
    cdt = w1_ref.dtype  # compute dtype of the MXU inputs (bf16 or f32)

    def layer(h, w_ref, b_ref, relu):
        acc = jnp.dot(h, w_ref[...], preferred_element_type=jnp.float32)
        acc = acc + b_ref[...]
        if relu:
            acc = jnp.maximum(acc, 0.0)
        return acc

    h = x_ref[...]                                   # already in compute dtype
    # --- zip ---
    h = layer(h, w1_ref, b1_ref, True).astype(cdt)
    h = layer(h, w2_ref, b2_ref, True).astype(cdt)
    h = layer(h, w3_ref, b3_ref, True).astype(cdt)
    # --- unzip ---
    h = layer(h, w4_ref, b4_ref, True).astype(cdt)
    h = layer(h, w5_ref, b5_ref, True).astype(cdt)
    h = layer(h, w6_ref, b6_ref, False)              # f32, no ReLU on last layer

    out_ref[...] = h.astype(out_ref.dtype)


@functools.partial(jax.jit, static_argnames=("block_batch", "compute_dtype"))
def transients_zipper_forward(x, params, *, block_batch=512,
                              compute_dtype=jnp.bfloat16):
    """x: (B, 300) f32.  params: dict of (in,out) f32 weights and (1,out) f32 biases.

    Returns (B, 300) f32.  block_batch is the batch tile fed to the MXU per grid
    step (sweep 512..1024 at large B; multiples of 256 on v6e/v7x, 128 on v5e).
    """
    B, F = x.shape
    assert F == HIST_LEN
    for idx in range(1, 7):
        assert params[f"b{idx}"].ndim == 2 and params[f"b{idx}"].shape[0] == 1, (
            "biases must be shape (1, out)")

    # ---- batch tile selection -------------------------------------------
    b16 = _round_up(B, 16)
    # Clamp to a multiple of 16 (bf16 (16,128) sublane packing) and to the batch.
    bb = max(16, (min(block_batch, b16) // 16) * 16)
    # v7x megacore: keep >= 2 grid steps when the batch allows it so the
    # "parallel" axis shards across both TensorCores.
    if b16 >= 256:
        bb = min(bb, max(128, (b16 // 2 // 16) * 16))
    b_pad = _round_up(B, bb)
    pad_f = HIST_PAD - HIST_LEN

    # ---- wrapper-side layout plumbing: pad 300 -> 384, cast weights ----
    w1 = jnp.pad(params["w1"], ((0, pad_f), (0, 0))).astype(compute_dtype)
    w2 = params["w2"].astype(compute_dtype)
    w3 = params["w3"].astype(compute_dtype)
    w4 = params["w4"].astype(compute_dtype)
    w5 = params["w5"].astype(compute_dtype)
    w6 = jnp.pad(params["w6"], ((0, 0), (0, pad_f))).astype(compute_dtype)
    b1 = params["b1"].astype(jnp.float32)
    b2 = params["b2"].astype(jnp.float32)
    b3 = params["b3"].astype(jnp.float32)
    b4 = params["b4"].astype(jnp.float32)
    b5 = params["b5"].astype(jnp.float32)
    b6 = jnp.pad(params["b6"], ((0, 0), (0, pad_f))).astype(jnp.float32)

    # pad + cast fuse into one HBM pass under jit.
    x_p = jnp.pad(x, ((0, b_pad - B), (0, pad_f))).astype(compute_dtype)

    def full_spec(arr):
        # Whole array resident in VMEM; constant index_map -> not re-DMA'd per step.
        return pl.BlockSpec(arr.shape, lambda i: (0,) * arr.ndim)

    grid = (b_pad // bb,)

    # Advisory cost estimate (kernel is MXU-bound).
    n_weight_elems = (HIST_PAD * 512 + 512 * 128 + 128 * EMBED_DIM
                      + EMBED_DIM * 128 + 128 * 512 + 512 * HIST_PAD)
    n_bias_elems = 512 + 128 + EMBED_DIM + 128 + 512 + HIST_PAD
    in_item = int(jnp.dtype(compute_dtype).itemsize)
    cost = pl.CostEstimate(
        flops=int(2 * b_pad * n_weight_elems),
        transcendentals=0,
        bytes_accessed=int(b_pad * HIST_PAD * (in_item + in_item)   # x in, out in compute dtype
                           + n_weight_elems * in_item + n_bias_elems * 4),
    )

    out_padded = pl.pallas_call(
        _zipper_kernel,
        out_shape=jax.ShapeDtypeStruct((b_pad, HIST_PAD), compute_dtype),
        grid_spec=pltpu.PrefetchScalarGridSpec(
            num_scalar_prefetch=0,
            grid=grid,
            in_specs=[
                pl.BlockSpec((bb, HIST_PAD), lambda i: (i, 0)),
                full_spec(w1), full_spec(b1),
                full_spec(w2), full_spec(b2),
                full_spec(w3), full_spec(b3),
                full_spec(w4), full_spec(b4),
                full_spec(w5), full_spec(b5),
                full_spec(w6), full_spec(b6),
            ],
            out_specs=pl.BlockSpec((bb, HIST_PAD), lambda i: (i, 0)),
        ),
        compiler_params=pltpu.CompilerParams(
            # Batch axis is independent -> sharded across TensorCores on v7x
            # when the grid has >= 2 steps (ensured above for large B).
            dimension_semantics=("parallel",),
            # Above v5e's 16 MiB scoped default, well under v7x's 64 MiB physical.
            vmem_limit_bytes=48 * 1024 * 1024,
        ),
        cost_estimate=cost,
    )(x_p, w1, b1, w2, b2, w3, b3, w4, b4, w5, b5, w6, b6)

    # Slice away batch/lane padding and cast back to f32 (fused under jit).
    return out_padded[:B, :HIST_LEN].astype(jnp.float32)


def init_params(key, histogram_length=HIST_LEN, embed_dim=EMBED_DIM):
    """Init matching PyTorch Linear shapes; weights stored transposed as (in, out)."""
    dims = [
        (histogram_length, 512),  # zip.0
        (512, 128),               # zip.2
        (128, embed_dim),         # zip.4
        (embed_dim, 128),         # unzip.0
        (128, 512),               # unzip.2
        (512, histogram_length),  # unzip.4
    ]
    params = {}
    for idx, (fan_in, fan_out) in enumerate(dims, start=1):
        key, kw, kb = jax.random.split(key, 3)
        bound = 1.0 / jnp.sqrt(fan_in)  # PyTorch default uniform(-1/sqrt(in), 1/sqrt(in))
        params[f"w{idx}"] = jax.random.uniform(
            kw, (fan_in, fan_out), jnp.float32, -bound, bound
        )
        params[f"b{idx}"] = jax.random.uniform(
            kb, (1, fan_out), jnp.float32, -bound, bound
        )
    return params


def reference_forward(x, params, compute_dtype=jnp.bfloat16):
    """Reference matching the kernel's numerics: bf16 weights AND bf16
    inter-layer activations, f32 accumulation, bf16 output rounded back to f32."""
    def q(a):
        return a.astype(compute_dtype).astype(jnp.float32)

    h = q(x)
    for idx in range(1, 6):
        h = q(jnp.maximum(h @ q(params[f"w{idx}"]) + params[f"b{idx}"], 0.0))
    out = h @ q(params["w6"]) + params["b6"]
    return q(out)


if __name__ == "__main__":
    key = jax.random.PRNGKey(0)
    key, kx = jax.random.split(key)

    batch = 16
    x = jax.random.normal(kx, (batch, HIST_LEN), jnp.float32)
    params = init_params(key)

    out = transients_zipper_forward(x, params)
    out = jax.block_until_ready(out)

    ref = reference_forward(x, params)
    assert out.shape == (batch, HIST_LEN)
    # bf16 weights/activations in both paths; differences are accumulation order only.
    assert jnp.allclose(out, ref, atol=5e-2, rtol=5e-2), "mismatch vs reference"

    print("KERNEL_OK")
</pallas_src>

<mosaic_0001>
module attributes {stable_mosaic.version = 11 : i64} {
  func.func @_zipper_kernel(%arg0: i32, %arg1: memref<16x384xbf16, #tpu.memory_space<vmem>>, %arg2: memref<384x512xbf16, #tpu.memory_space<vmem>>, %arg3: memref<1x512xf32, #tpu.memory_space<vmem>>, %arg4: memref<512x128xbf16, #tpu.memory_space<vmem>>, %arg5: memref<1x128xf32, #tpu.memory_space<vmem>>, %arg6: memref<128x128xbf16, #tpu.memory_space<vmem>>, %arg7: memref<1x128xf32, #tpu.memory_space<vmem>>, %arg8: memref<128x128xbf16, #tpu.memory_space<vmem>>, %arg9: memref<1x128xf32, #tpu.memory_space<vmem>>, %arg10: memref<128x512xbf16, #tpu.memory_space<vmem>>, %arg11: memref<1x512xf32, #tpu.memory_space<vmem>>, %arg12: memref<512x384xbf16, #tpu.memory_space<vmem>>, %arg13: memref<1x384xf32, #tpu.memory_space<vmem>>, %arg14: memref<16x384xbf16, #tpu.memory_space<vmem>>) attributes {dimension_semantics = [#tpu.dimension_semantics<parallel>], iteration_bounds = array<i64: 1>, scalar_prefetch = 0 : i64, scratch_operands = 0 : i64, tpu.core_type = #tpu.core_type<tc>, window_params = [{transform_indices = @transform_0, window_bounds = array<i64: 16, 384>}, {pipeline_mode = #tpu.pipeline_mode<synchronous>, transform_indices = @transform_1, window_bounds = array<i64: 384, 512>}, {pipeline_mode = #tpu.pipeline_mode<synchronous>, transform_indices = @transform_2, window_bounds = array<i64: 1, 512>}, {pipeline_mode = #tpu.pipeline_mode<synchronous>, transform_indices = @transform_3, window_bounds = array<i64: 512, 128>}, {pipeline_mode = #tpu.pipeline_mode<synchronous>, transform_indices = @transform_4, window_bounds = array<i64: 1, 128>}, {pipeline_mode = #tpu.pipeline_mode<synchronous>, transform_indices = @transform_5, window_bounds = array<i64: 128, 128>}, {pipeline_mode = #tpu.pipeline_mode<synchronous>, transform_indices = @transform_6, window_bounds = array<i64: 1, 128>}, {pipeline_mode = #tpu.pipeline_mode<synchronous>, transform_indices = @transform_7, window_bounds = array<i64: 128, 128>}, {pipeline_mode = #tpu.pipeline_mode<synchronous>, transform_indices = @transform_8, window_bounds = array<i64: 1, 128>}, {pipeline_mode = #tpu.pipeline_mode<synchronous>, transform_indices = @transform_9, window_bounds = array<i64: 128, 512>}, {pipeline_mode = #tpu.pipeline_mode<synchronous>, transform_indices = @transform_10, window_bounds = array<i64: 1, 512>}, {pipeline_mode = #tpu.pipeline_mode<synchronous>, transform_indices = @transform_11, window_bounds = array<i64: 512, 384>}, {pipeline_mode = #tpu.pipeline_mode<synchronous>, transform_indices = @transform_12, window_bounds = array<i64: 1, 384>}, {transform_indices = @transform_13, window_bounds = array<i64: 16, 384>}]} {
    %c0 = arith.constant 0 : index
    %c0_0 = arith.constant 0 : index
    %0 = vector.load %arg1[%c0, %c0_0] : memref<16x384xbf16, #tpu.memory_space<vmem>>, vector<16x384xbf16>
    %c0_1 = arith.constant 0 : index
    %c0_2 = arith.constant 0 : index
    %1 = vector.load %arg2[%c0_1, %c0_2] : memref<384x512xbf16, #tpu.memory_space<vmem>>, vector<384x512xbf16>
    %cst = arith.constant dense<0.000000e+00> : vector<16x512xf32>
    %2 = tpu.matmul %0, %1, %cst {dimension_numbers = #tpu.dot_dimension_numbers<[1], [0], [0], [1], [0, 0, 1, 1], [], []>} : vector<16x384xbf16>, vector<384x512xbf16>, vector<16x512xf32> -> vector<16x512xf32>
    %c0_3 = arith.constant 0 : index
    %c0_4 = arith.constant 0 : index
    %3 = vector.load %arg3[%c0_3, %c0_4] : memref<1x512xf32, #tpu.memory_space<vmem>>, vector<1x512xf32>
    %4 = vector.broadcast %3 : vector<1x512xf32> to vector<16x512xf32>
    %5 = arith.addf %2, %4 : vector<16x512xf32>
    %cst_5 = arith.constant 0.000000e+00 : f32
    %6 = vector.broadcast %cst_5 : f32 to vector<16x512xf32>
    %7 = arith.maximumf %5, %6 : vector<16x512xf32>
    %8 = arith.truncf %7 : vector<16x512xf32> to vector<16x512xbf16>
    %c0_6 = arith.constant 0 : index
    %c0_7 = arith.constant 0 : index
    %9 = vector.load %arg4[%c0_6, %c0_7] : memref<512x128xbf16, #tpu.memory_space<vmem>>, vector<512x128xbf16>
    %cst_8 = arith.constant dense<0.000000e+00> : vector<16x128xf32>
    %10 = tpu.matmul %8, %9, %cst_8 {dimension_numbers = #tpu.dot_dimension_numbers<[1], [0], [0], [1], [0, 0, 1, 1], [], []>} : vector<16x512xbf16>, vector<512x128xbf16>, vector<16x128xf32> -> vector<16x128xf32>
    %c0_9 = arith.constant 0 : index
    %c0_10 = arith.constant 0 : index
    %11 = vector.load %arg5[%c0_9, %c0_10] : memref<1x128xf32, #tpu.memory_space<vmem>>, vector<1x128xf32>
    %12 = vector.broadcast %11 : vector<1x128xf32> to vector<16x128xf32>
    %13 = arith.addf %10, %12 : vector<16x128xf32>
    %cst_11 = arith.constant 0.000000e+00 : f32
    %14 = vector.broadcast %cst_11 : f32 to vector<16x128xf32>
    %15 = arith.maximumf %13, %14 : vector<16x128xf32>
    %16 = arith.truncf %15 : vector<16x128xf32> to vector<16x128xbf16>
    %c0_12 = arith.constant 0 : index
    %c0_13 = arith.constant 0 : index
    %17 = vector.load %arg6[%c0_12, %c0_13] : memref<128x128xbf16, #tpu.memory_space<vmem>>, vector<128x128xbf16>
    %cst_14 = arith.constant dense<0.000000e+00> : vector<16x128xf32>
    %18 = tpu.matmul %16, %17, %cst_14 {dimension_numbers = #tpu.dot_dimension_numbers<[1], [0], [0], [1], [0, 0, 1, 1], [], []>} : vector<16x128xbf16>, vector<128x128xbf16>, vector<16x128xf32> -> vector<16x128xf32>
    %c0_15 = arith.constant 0 : index
    %c0_16 = arith.constant 0 : index
    %19 = vector.load %arg7[%c0_15, %c0_16] : memref<1x128xf32, #tpu.memory_space<vmem>>, vector<1x128xf32>
    %20 = vector.broadcast %19 : vector<1x128xf32> to vector<16x128xf32>
    %21 = arith.addf %18, %20 : vector<16x128xf32>
    %cst_17 = arith.constant 0.000000e+00 : f32
    %22 = vector.broadcast %cst_17 : f32 to vector<16x128xf32>
    %23 = arith.maximumf %21, %22 : vector<16x128xf32>
    %24 = arith.truncf %23 : vector<16x128xf32> to vector<16x128xbf16>
    %c0_18 = arith.constant 0 : index
    %c0_19 = arith.constant 0 : index
    %25 = vector.load %arg8[%c0_18, %c0_19] : memref<128x128xbf16, #tpu.memory_space<vmem>>, vector<128x128xbf16>
    %cst_20 = arith.constant dense<0.000000e+00> : vector<16x128xf32>
    %26 = tpu.matmul %24, %25, %cst_20 {dimension_numbers = #tpu.dot_dimension_numbers<[1], [0], [0], [1], [0, 0, 1, 1], [], []>} : vector<16x128xbf16>, vector<128x128xbf16>, vector<16x128xf32> -> vector<16x128xf32>
    %c0_21 = arith.constant 0 : index
    %c0_22 = arith.constant 0 : index
    %27 = vector.load %arg9[%c0_21, %c0_22] : memref<1x128xf32, #tpu.memory_space<vmem>>, vector<1x128xf32>
    %28 = vector.broadcast %27 : vector<1x128xf32> to vector<16x128xf32>
    %29 = arith.addf %26, %28 : vector<16x128xf32>
    %cst_23 = arith.constant 0.000000e+00 : f32
    %30 = vector.broadcast %cst_23 : f32 to vector<16x128xf32>
    %31 = arith.maximumf %29, %30 : vector<16x128xf32>
    %32 = arith.truncf %31 : vector<16x128xf32> to vector<16x128xbf16>
    %c0_24 = arith.constant 0 : index
    %c0_25 = arith.constant 0 : index
    %33 = vector.load %arg10[%c0_24, %c0_25] : memref<128x512xbf16, #tpu.memory_space<vmem>>, vector<128x512xbf16>
    %cst_26 = arith.constant dense<0.000000e+00> : vector<16x512xf32>
    %34 = tpu.matmul %32, %33, %cst_26 {dimension_numbers = #tpu.dot_dimension_numbers<[1], [0], [0], [1], [0, 0, 1, 1], [], []>} : vector<16x128xbf16>, vector<128x512xbf16>, vector<16x512xf32> -> vector<16x512xf32>
    %c0_27 = arith.constant 0 : index
    %c0_28 = arith.constant 0 : index
    %35 = vector.load %arg11[%c0_27, %c0_28] : memref<1x512xf32, #tpu.memory_space<vmem>>, vector<1x512xf32>
    %36 = vector.broadcast %35 : vector<1x512xf32> to vector<16x512xf32>
    %37 = arith.addf %34, %36 : vector<16x512xf32>
    %cst_29 = arith.constant 0.000000e+00 : f32
    %38 = vector.broadcast %cst_29 : f32 to vector<16x512xf32>
    %39 = arith.maximumf %37, %38 : vector<16x512xf32>
    %40 = arith.truncf %39 : vector<16x512xf32> to vector<16x512xbf16>
    %c0_30 = arith.constant 0 : index
    %c0_31 = arith.constant 0 : index
    %41 = vector.load %arg12[%c0_30, %c0_31] : memref<512x384xbf16, #tpu.memory_space<vmem>>, vector<512x384xbf16>
    %cst_32 = arith.constant dense<0.000000e+00> : vector<16x384xf32>
    %42 = tpu.matmul %40, %41, %cst_32 {dimension_numbers = #tpu.dot_dimension_numbers<[1], [0], [0], [1], [0, 0, 1, 1], [], []>} : vector<16x512xbf16>, vector<512x384xbf16>, vector<16x384xf32> -> vector<16x384xf32>
    %c0_33 = arith.constant 0 : index
    %c0_34 = arith.constant 0 : index
    %43 = vector.load %arg13[%c0_33, %c0_34] : memref<1x384xf32, #tpu.memory_space<vmem>>, vector<1x384xf32>
    %44 = vector.broadcast %43 : vector<1x384xf32> to vector<16x384xf32>
    %45 = arith.addf %42, %44 : vector<16x384xf32>
    %46 = arith.truncf %45 : vector<16x384xf32> to vector<16x384xbf16>
    %c0_35 = arith.constant 0 : index
    %c0_36 = arith.constant 0 : index
    %47 = vector.load %arg14[%c0_35, %c0_36] : memref<16x384xbf16, #tpu.memory_space<vmem>>, vector<16x384xbf16>
    tpu.vector_store %arg14[%c0_35, %c0_36], %46 {strides = array<i32>} : memref<16x384xbf16, #tpu.memory_space<vmem>>, vector<16x384xbf16>,
    return
  }
  func.func @transform_0(%arg0: i32) -> (i32, i32) {
    %c0_i32 = arith.constant 0 : i32
    %c0_i32_0 = arith.constant 0 : i32
    return %arg0, %c0_i32 : i32, i32
  }
  func.func @transform_1(%arg0: i32) -> (i32, i32) {
    %c0_i32 = arith.constant 0 : i32
    %c0_i32_0 = arith.constant 0 : i32
    %c0_i32_1 = arith.constant 0 : i32
    return %c0_i32, %c0_i32_0 : i32, i32
  }
  func.func @transform_2(%arg0: i32) -> (i32, i32) {
    %c0_i32 = arith.constant 0 : i32
    %c0_i32_0 = arith.constant 0 : i32
    %c0_i32_1 = arith.constant 0 : i32
    return %c0_i32, %c0_i32_0 : i32, i32
  }
  func.func @transform_3(%arg0: i32) -> (i32, i32) {
    %c0_i32 = arith.constant 0 : i32
    %c0_i32_0 = arith.constant 0 : i32
    %c0_i32_1 = arith.constant 0 : i32
    return %c0_i32, %c0_i32_0 : i32, i32
  }
  func.func @transform_4(%arg0: i32) -> (i32, i32) {
    %c0_i32 = arith.constant 0 : i32
    %c0_i32_0 = arith.constant 0 : i32
    %c0_i32_1 = arith.constant 0 : i32
    return %c0_i32, %c0_i32_0 : i32, i32
  }
  func.func @transform_5(%arg0: i32) -> (i32, i32) {
    %c0_i32 = arith.constant 0 : i32
    %c0_i32_0 = arith.constant 0 : i32
    %c0_i32_1 = arith.constant 0 : i32
    return %c0_i32, %c0_i32_0 : i32, i32
  }
  func.func @transform_6(%arg0: i32) -> (i32, i32) {
    %c0_i32 = arith.constant 0 : i32
    %c0_i32_0 = arith.constant 0 : i32
    %c0_i32_1 = arith.constant 0 : i32
    return %c0_i32, %c0_i32_0 : i32, i32
  }
  func.func @transform_7(%arg0: i32) -> (i32, i32) {
    %c0_i32 = arith.constant 0 : i32
    %c0_i32_0 = arith.constant 0 : i32
    %c0_i32_1 = arith.constant 0 : i32
    return %c0_i32, %c0_i32_0 : i32, i32
  }
  func.func @transform_8(%arg0: i32) -> (i32, i32) {
    %c0_i32 = arith.constant 0 : i32
    %c0_i32_0 = arith.constant 0 : i32
    %c0_i32_1 = arith.constant 0 : i32
    return %c0_i32, %c0_i32_0 : i32, i32
  }
  func.func @transform_9(%arg0: i32) -> (i32, i32) {
    %c0_i32 = arith.constant 0 : i32
    %c0_i32_0 = arith.constant 0 : i32
    %c0_i32_1 = arith.constant 0 : i32
    return %c0_i32, %c0_i32_0 : i32, i32
  }
  func.func @transform_10(%arg0: i32) -> (i32, i32) {
    %c0_i32 = arith.constant 0 : i32
    %c0_i32_0 = arith.constant 0 : i32
    %c0_i32_1 = arith.constant 0 : i32
    return %c0_i32, %c0_i32_0 : i32, i32
  }
  func.func @transform_11(%arg0: i32) -> (i32, i32) {
    %c0_i32 = arith.constant 0 : i32
    %c0_i32_0 = arith.constant 0 : i32
    %c0_i32_1 = arith.constant 0 : i32
    return %c0_i32, %c0_i32_0 : i32, i32
  }
  func.func @transform_12(%arg0: i32) -> (i32, i32) {
    %c0_i32 = arith.constant 0 : i32
    %c0_i32_0 = arith.constant 0 : i32
    %c0_i32_1 = arith.constant 0 : i32
    return %c0_i32, %c0_i32_0 : i32, i32
  }
  func.func @transform_13(%arg0: i32) -> (i32, i32) {
    %c0_i32 = arith.constant 0 : i32
    %c0_i32_0 = arith.constant 0 : i32
    return %arg0, %c0_i32 : i32, i32
  }
}

</mosaic_0001>

<bundles_post_ra>
// kernel: transients_zipper_forward.1
= control target key start
LH: loop header
LB: loop body
LE: loop exit
PB: predicated region body
PF: predicated region fallthrough
CT: control target
= control target key end

     0   :  { %v3397_v1 = vmov 0   ;;  %vm3399_vm0 = vmmov 0   ;;  %s4388_s1 = inlined_call_operand.vmem [shape: bf16[384,512], index: 1, kind: input, shape index: {}]   ;;  %s4389_s0 = inlined_call_operand.vmem [shape: bf16[16,384], index: 0, kind: input, shape index: {}]   ;;  %s4390_s3 = inlined_call_operand.vmem [shape: bf16[512,128], index: 3, kind: input, shape index: {}]   ;;  %s4391_s2 = inlined_call_operand.vmem [shape: f32[1,512], index: 2, kind: input, shape index: {}]   ;;  %s4392_s5 = inlined_call_operand.vmem [shape: bf16[128,128], index: 5, kind: input, shape index: {}]   ;;  %s4393_s7 = inlined_call_operand.vmem [shape: bf16[128,128], index: 7, kind: input, shape index: {}]   ;;  %s4394_s4 = inlined_call_operand.vmem [shape: f32[1,128], index: 4, kind: input, shape index: {}]   ;;  %s4395_s9 = inlined_call_operand.vmem [shape: bf16[128,512], index: 9, kind: input, shape index: {}]   ;;  %s4396_s6 = inlined_call_operand.vmem [shape: f32[1,128], index: 6, kind: input, shape index: {}]   ;;  %s4397_s11 = inlined_call_operand.vmem [shape: bf16[512,384], index: 11, kind: input, shape index: {}]   ;;  %s4398_s8 = inlined_call_operand.vmem [shape: f32[1,128], index: 8, kind: input, shape index: {}]   ;;  %s4399_s10 = inlined_call_operand.vmem [shape: f32[1,512], index: 10, kind: input, shape index: {}]   ;;  %s4400_s12 = inlined_call_operand.vmem [shape: f32[1,384], index: 12, kind: input, shape index: {}]   ;;  %s4401_s13 = inlined_call_operand.vmem [shape: bf16[16,384], index: 13, kind: output, shape index: {}]  }
   0x1   :  { %v3025_v0 = vld [vmem:[%s4388_s1 + $0xe4] ss:$16 sps:$4 sm:$0xff]   ;;  %738 = vmatprep.mubr.bf16.mxu1 %v3397_v1  ;;  %v3029_v3 = vld [vmem:[%s4388_s1 + $0xe0] ss:$16 sps:$4 sm:$0xff]   ;;  %v3078_v34 = vld [vmem:[%s4388_s1 + $0xec] ss:$16 sps:$4 sm:$0xff]  }
   0x2   :  { %v3027_v2 = vld [vmem:[%s4388_s1 + $0x2e4] ss:$16 sps:$4 sm:$0xff]   ;;  %663 = vmatprep.subr.bf16.mxu0 %v3025_v0  ;;  %v3030_v4 = vld [vmem:[%s4388_s1 + $0x2e0] ss:$16 sps:$4 sm:$0xff]   ;;  %v3076_v36 = vld [vmem:[%s4388_s1 + $0xe8] ss:$16 sps:$4 sm:$0xff]  }
   0x3   :  { %706 = vmatprep.subr.bf16.mxu1 %v3027_v2  ;;  %v3031_v5 = vld [vmem:[%s4388_s1 + $0xc4] ss:$16 sps:$4 sm:$0xff]   ;;  %664 = vmatpush1.bf16.msra.mxu0 %v3029_v3  ;;  %v3035_v7 = vld [vmem:[%s4388_s1 + $0xc0] ss:$16 sps:$4 sm:$0xff]   ;;  %v3084_v39 = vld [vmem:[%s4388_s1 + $0xcc] ss:$16 sps:$4 sm:$0xff]  }
   0x4   :  { %707 = vmatpush1.bf16.msra.mxu1 %v3030_v4  ;;  %v3033_v6 = vld [vmem:[%s4388_s1 + $0x2c4] ss:$16 sps:$4 sm:$0xff]   ;;  %665 = vmatprep.subr.bf16.mxu0 %v3031_v5  ;;  %v3036_v8 = vld [vmem:[%s4388_s1 + $0x2c0] ss:$16 sps:$4 sm:$0xff]   ;;  %v3082_v40 = vld [vmem:[%s4388_s1 + $0xc8] ss:$16 sps:$4 sm:$0xff]  }
   0x5   :  { %708 = vmatprep.subr.bf16.mxu1 %v3033_v6  ;;  %v3037_v9 = vld [vmem:[%s4388_s1 + $0xa4] ss:$16 sps:$4 sm:$0xff]   ;;  %v3041_v11 = vld [vmem:[%s4388_s1 + $0xa0] ss:$16 sps:$4 sm:$0xff]   ;;  %v3090_v43 = vld [vmem:[%s4388_s1 + $0xac] ss:$16 sps:$4 sm:$0xff]  }
   0x6   :  { %v3039_v10 = vld [vmem:[%s4388_s1 + $0x2a4] ss:$16 sps:$4 sm:$0xff]   ;;  %v3042_v12 = vld [vmem:[%s4388_s1 + $0x2a0] ss:$16 sps:$4 sm:$0xff]   ;;  %v3088_v44 = vld [vmem:[%s4388_s1 + $0xa8] ss:$16 sps:$4 sm:$0xff]  }
   0x7   :  { %666 = vmatpush1.bf16.msra.mxu0 %v3035_v7  ;;  %v3043_v13 = vld [vmem:[%s4388_s1 + $0x84] ss:$16 sps:$4 sm:$0xff]   ;;  %v3047_v15 = vld [vmem:[%s4388_s1 + $0x80] ss:$16 sps:$4 sm:$0xff]   ;;  %v3096_v47 = vld [vmem:[%s4388_s1 + $0x8c] ss:$16 sps:$4 sm:$0xff]  }
   0x8   :  { %709 = vmatpush1.bf16.msra.mxu1 %v3036_v8  ;;  %667 = vmatprep.subr.bf16.mxu0 %v3037_v9  ;;  %v3045_v14 = vld [vmem:[%s4388_s1 + $0x284] ss:$16 sps:$4 sm:$0xff]   ;;  %v3048_v16 = vld [vmem:[%s4388_s1 + $0x280] ss:$16 sps:$4 sm:$0xff]   ;;  %v3094_v48 = vld [vmem:[%s4388_s1 + $0x88] ss:$16 sps:$4 sm:$0xff]  }
   0x9   :  { %710 = vmatprep.subr.bf16.mxu1 %v3039_v10  ;;  %v3049_v17 = vld [vmem:[%s4388_s1 + $0x64] ss:$16 sps:$4 sm:$0xff]   ;;  %v3053_v19 = vld [vmem:[%s4388_s1 + $0x60] ss:$16 sps:$4 sm:$0xff]   ;;  %v3102_v52 = vld [vmem:[%s4388_s1 + $0x6c] ss:$16 sps:$4 sm:$0xff]  }
   0xa   :  { %v3051_v18 = vld [vmem:[%s4388_s1 + $0x264] ss:$16 sps:$4 sm:$0xff]   ;;  %v3054_v20 = vld [vmem:[%s4388_s1 + $0x260] ss:$16 sps:$4 sm:$0xff]   ;;  %v3100_v53 = vld [vmem:[%s4388_s1 + $0x68] ss:$16 sps:$4 sm:$0xff]  }
   0xb   :  { %668 = vmatpush1.bf16.msra.mxu0 %v3041_v11  ;;  %v3055_v21 = vld [vmem:[%s4388_s1 + $0x44] ss:$16 sps:$4 sm:$0xff]   ;;  %v3059_v23 = vld [vmem:[%s4388_s1 + $0x40] ss:$16 sps:$4 sm:$0xff]   ;;  %v3108_v56 = vld [vmem:[%s4388_s1 + $0x4c] ss:$16 sps:$4 sm:$0xff]  }
   0xc   :  { %711 = vmatpush1.bf16.msra.mxu1 %v3042_v12  ;;  %669 = vmatprep.subr.bf16.mxu0 %v3043_v13  ;;  %v3057_v22 = vld [vmem:[%s4388_s1 + $0x244] ss:$16 sps:$4 sm:$0xff]   ;;  %v3060_v24 = vld [vmem:[%s4388_s1 + $0x240] ss:$16 sps:$4 sm:$0xff]   ;;  %v3106_v57 = vld [vmem:[%s4388_s1 + $0x48] ss:$16 sps:$4 sm:$0xff]  }
   0xd   :  { %712 = vmatprep.subr.bf16.mxu1 %v3045_v14  ;;  %v3061_v25 = vld [vmem:[%s4388_s1 + $0x24] ss:$16 sps:$4 sm:$0xff]   ;;  %v3065_v27 = vld [vmem:[%s4388_s1 + $0x20] ss:$16 sps:$4 sm:$0xff]   ;;  %v3114_v60 = vld [vmem:[%s4388_s1 + $0x2c] ss:$16 sps:$4 sm:$0xff]  }
   0xe   :  { %v3063_v26 = vld [vmem:[%s4388_s1 + $0x224] ss:$16 sps:$4 sm:$0xff]   ;;  %v3066_v28 = vld [vmem:[%s4388_s1 + $0x220] ss:$16 sps:$4 sm:$0xff]   ;;  %v3112_v61 = vld [vmem:[%s4388_s1 + $0x28] ss:$16 sps:$4 sm:$0xff]  }
   0xf   :  { %670 = vmatpush1.bf16.msra.mxu0 %v3047_v15  ;;  %v3067_v29 = vld [vmem:[%s4388_s1 + $0x4] ss:$16 sps:$4 sm:$0xff]   ;;  %v3071_v31 = vld [vmem:[%s4388_s1] ss:$16 sps:$4 sm:$0xff]   ;;  %v3120_v0 = vld [vmem:[%s4388_s1 + $0xc] ss:$16 sps:$4 sm:$0xff]  }
  0x10   :  { %713 = vmatpush1.bf16.msra.mxu1 %v3048_v16  ;;  %671 = vmatprep.subr.bf16.mxu0 %v3049_v17  ;;  %v3069_v30 = vld [vmem:[%s4388_s1 + $0x204] ss:$16 sps:$4 sm:$0xff]   ;;  %v3072_v32 = vld [vmem:[%s4388_s1 + $0x200] ss:$16 sps:$4 sm:$0xff]   ;;  %v3118_v2 = vld [vmem:[%s4388_s1 + $0x8] ss:$16 sps:$4 sm:$0xff]  }
  0x11   :  { %714 = vmatprep.subr.bf16.mxu1 %v3051_v18  ;;  %v3073_v33 = vld [vmem:[%s4388_s1 + $0x1e4] ss:$16 sps:$4 sm:$0xff]   ;;  %v3079_v37 = vld [vmem:[%s4388_s1 + $0x1e0] ss:$16 sps:$4 sm:$0xff]   ;;  %v3127_v4 = vld [vmem:[%s4388_s1 + $0x1ec] ss:$16 sps:$4 sm:$0xff]  }
  0x12   :  { %v3576_v35 = vld [vmem:[%s4389_s0 + $0x8] ss:$12 sps:$4 sm:$0xff]   ;;  %v3085_v41 = vld [vmem:[%s4388_s1 + $0x1c0] ss:$16 sps:$4 sm:$0xff]   ;;  %v3130_v5 = vld [vmem:[%s4388_s1 + $0x2ec] ss:$16 sps:$4 sm:$0xff]  }
  0x13   :  { %672 = vmatpush1.bf16.msra.mxu0 %v3053_v19  ;;  %v3080_v38 = vld [vmem:[%s4388_s1 + $0x1c4] ss:$16 sps:$4 sm:$0xff]   ;;  %v3091_v45 = vld [vmem:[%s4388_s1 + $0x1a0] ss:$16 sps:$4 sm:$0xff]   ;;  %v3125_v7 = vld [vmem:[%s4388_s1 + $0x1e8] ss:$16 sps:$4 sm:$0xff]  }
  0x14   :  { %715 = vmatpush1.bf16.msra.mxu1 %v3054_v20  ;;  %673 = vmatprep.subr.bf16.mxu0 %v3055_v21  ;;  %v3086_v42 = vld [vmem:[%s4388_s1 + $0x1a4] ss:$16 sps:$4 sm:$0xff]   ;;  %v3097_v49 = vld [vmem:[%s4388_s1 + $0x180] ss:$16 sps:$4 sm:$0xff]   ;;  %v3128_v8 = vld [vmem:[%s4388_s1 + $0x2e8] ss:$16 sps:$4 sm:$0xff]  }
  0x15   :  { %716 = vmatprep.subr.bf16.mxu1 %v3057_v22  ;;  %v3092_v46 = vld [vmem:[%s4388_s1 + $0x184] ss:$16 sps:$4 sm:$0xff]   ;;  %v3103_v54 = vld [vmem:[%s4388_s1 + $0x160] ss:$16 sps:$4 sm:$0xff]   ;;  %v3133_v9 = vld [vmem:[%s4388_s1 + $0x1cc] ss:$16 sps:$4 sm:$0xff]  }
  0x16   :  { %v3098_v50 = vld [vmem:[%s4388_s1 + $0x164] ss:$16 sps:$4 sm:$0xff]   ;;  %v3109_v58 = vld [vmem:[%s4388_s1 + $0x140] ss:$16 sps:$4 sm:$0xff]   ;;  %v3136_v10 = vld [vmem:[%s4388_s1 + $0x2cc] ss:$16 sps:$4 sm:$0xff]  }
  0x17   :  { %674 = vmatpush1.bf16.msra.mxu0 %v3059_v23  ;;  %v3124_v51 = vld [vmem:[%s4389_s0 + $0x4] ss:$12 sps:$4 sm:$0xff]   ;;  %v3681_v6 = vld [vmem:[%s4389_s0] ss:$12 sps:$4 sm:$0xff]   ;;  %v3131_v11 = vld [vmem:[%s4388_s1 + $0x1c8] ss:$16 sps:$4 sm:$0xff]  }
  0x18   :  { %717 = vmatpush1.bf16.msra.mxu1 %v3060_v24  ;;  %675 = vmatprep.subr.bf16.mxu0 %v3061_v25  ;;  %v3104_v55 = vld [vmem:[%s4388_s1 + $0x144] ss:$16 sps:$4 sm:$0xff]   ;;  %v3115_v62 = vld [vmem:[%s4388_s1 + $0x120] ss:$16 sps:$4 sm:$0xff]   ;;  %v3134_v12 = vld [vmem:[%s4388_s1 + $0x2c8] ss:$16 sps:$4 sm:$0xff]  }
  0x19   :  { %718 = vmatprep.subr.bf16.mxu1 %v3063_v26  ;;  %695 = vmatprep.mubr.bf16.mxu0 %v3124_v51  ;;  %v3110_v59 = vld [vmem:[%s4388_s1 + $0x124] ss:$16 sps:$4 sm:$0xff]   ;;  %v3121_v3 = vld [vmem:[%s4388_s1 + $0x100] ss:$16 sps:$4 sm:$0xff]   ;;  %v3139_v13 = vld [vmem:[%s4388_s1 + $0x1ac] ss:$16 sps:$4 sm:$0xff]  }
  0x1a   :  { %v3116_v63 = vld [vmem:[%s4388_s1 + $0x104] ss:$16 sps:$4 sm:$0xff]   ;;  %v3142_v14 = vld [vmem:[%s4388_s1 + $0x2ac] ss:$16 sps:$4 sm:$0xff]   ;;  %v3137_v15 = vld [vmem:[%s4388_s1 + $0x1a8] ss:$16 sps:$4 sm:$0xff]  }
  0x1b   :  { %676 = vmatpush1.bf16.msra.mxu0 %v3065_v27  ;;  %v3140_v16 = vld [vmem:[%s4388_s1 + $0x2a8] ss:$16 sps:$4 sm:$0xff]   ;;  %v3145_v17 = vld [vmem:[%s4388_s1 + $0x18c] ss:$16 sps:$4 sm:$0xff]  }
  0x1c   :  { %719 = vmatpush1.bf16.msra.mxu1 %v3066_v28  ;;  %677 = vmatprep.subr.bf16.mxu0 %v3067_v29  ;;  %v3148_v18 = vld [vmem:[%s4388_s1 + $0x28c] ss:$16 sps:$4 sm:$0xff]   ;;  %v3143_v19 = vld [vmem:[%s4388_s1 + $0x188] ss:$16 sps:$4 sm:$0xff]  }
  0x1d   :  { %720 = vmatprep.subr.bf16.mxu1 %v3069_v30  ;;  %v3146_v20 = vld [vmem:[%s4388_s1 + $0x288] ss:$16 sps:$4 sm:$0xff]   ;;  %v3151_v21 = vld [vmem:[%s4388_s1 + $0x16c] ss:$16 sps:$4 sm:$0xff]  }
  0x1e   :  { %v3154_v22 = vld [vmem:[%s4388_s1 + $0x26c] ss:$16 sps:$4 sm:$0xff]   ;;  %v3149_v23 = vld [vmem:[%s4388_s1 + $0x168] ss:$16 sps:$4 sm:$0xff]  }
  0x1f   :  { %678 = vmatpush1.bf16.msra.mxu0 %v3071_v31  ;;  %v3152_v24 = vld [vmem:[%s4388_s1 + $0x268] ss:$16 sps:$4 sm:$0xff]   ;;  %v3157_v25 = vld [vmem:[%s4388_s1 + $0x14c] ss:$16 sps:$4 sm:$0xff]  }
  0x20   :  { %721 = vmatpush1.bf16.msra.mxu1 %v3072_v32  ;;  %679 = vmatprep.subr.bf16.mxu0 %v3073_v33  ;;  %v3160_v26 = vld [vmem:[%s4388_s1 + $0x24c] ss:$16 sps:$4 sm:$0xff]   ;;  %v3155_v27 = vld [vmem:[%s4388_s1 + $0x148] ss:$16 sps:$4 sm:$0xff]  }
  0x21   :  { %749 = vmatprep.subr.bf16.mxu1 %v3078_v34  ;;  %v3158_v28 = vld [vmem:[%s4388_s1 + $0x248] ss:$16 sps:$4 sm:$0xff]   ;;  %v3163_v29 = vld [vmem:[%s4388_s1 + $0x12c] ss:$16 sps:$4 sm:$0xff]  }
  0x22   :  { %v3166_v30 = vld [vmem:[%s4388_s1 + $0x22c] ss:$16 sps:$4 sm:$0xff]   ;;  %v3161_v31 = vld [vmem:[%s4388_s1 + $0x128] ss:$16 sps:$4 sm:$0xff]  }
  0x23   :  { %739 = vmatmul.mubr.bf16.vlgmr.msra.gmra.mxu1 %v3576_v35  ;;  %680 = vmatpush2.bf16.msra.mxu0 %v3079_v37  ;;  %v3164_v32 = vld [vmem:[%s4388_s1 + $0x228] ss:$16 sps:$4 sm:$0xff]   ;;  %v3169_v33 = vld [vmem:[%s4388_s1 + $0x10c] ss:$16 sps:$4 sm:$0xff]  }
  0x24   :  { %750 = vmatpush1.bf16.msra.mxu1 %v3076_v36  ;;  %681 = vmatprep.subr.bf16.mxu0 %v3080_v38  ;;  %v3172_v34 = vld [vmem:[%s4388_s1 + $0x20c] ss:$16 sps:$4 sm:$0xff]   ;;  %v3167_v36 = vld [vmem:[%s4388_s1 + $0x108] ss:$16 sps:$4 sm:$0xff]  }
  0x25   :  { %751 = vmatprep.subr.bf16.mxu1 %v3084_v39  ;;  %781 = vmatprep.mubr.bf16.mxu1 %v3124_v51  ;;  %v3170_v37 = vld [vmem:[%s4388_s1 + $0x208] ss:$16 sps:$4 sm:$0xff]   ;;  %v3187_v51 = vld [vmem:[%s4390_s3 + $0x40] sm:$0xff]  }
  0x26   :  { %v3173_v38 = vld [vmem:[%s4390_s3 + $0x78] sm:$0xff]  }
  0x27   :  { %682 = vmatpush2.bf16.msra.mxu0 %v3085_v41  ;;  %v3174_v39 = vld [vmem:[%s4390_s3 + $0x38] sm:$0xff]   ;;  %v3176_v41 = vld [vmem:[%s4390_s3 + $0x30] sm:$0xff]  }
  0x28   :  { %752 = vmatpush1.bf16.msra.mxu1 %v3082_v40  ;;  %683 = vmatprep.subr.bf16.mxu0 %v3086_v42  ;;  %v3175_v40 = vld [vmem:[%s4390_s3 + $0x70] sm:$0xff]   ;;  %v3178_v42 = vld [vmem:[%s4390_s3 + $0x28] sm:$0xff]  }
  0x29   :  { %753 = vmatprep.subr.bf16.mxu1 %v3090_v43  ;;  %v3179_v43 = vld [vmem:[%s4390_s3 + $0x60] sm:$0xff]  }
  0x2b   :  { %684 = vmatpush2.bf16.msra.mxu0 %v3091_v45  ;;  %v3181_v45 = vld [vmem:[%s4390_s3 + $0x58] sm:$0xff]  }
  0x2c   :  { %754 = vmatpush1.bf16.msra.mxu1 %v3088_v44  ;;  %685 = vmatprep.subr.bf16.mxu0 %v3092_v46  ;;  %v3180_v44 = vld [vmem:[%s4390_s3 + $0x20] sm:$0xff]   ;;  %v3182_v46 = vld [vmem:[%s4390_s3 + $0x18] sm:$0xff]  }
  0x2d   :  { %755 = vmatprep.subr.bf16.mxu1 %v3096_v47  ;;  %v3183_v47 = vld [vmem:[%s4390_s3 + $0x50] sm:$0xff]  }
  0x2f   :  { %686 = vmatpush2.bf16.msra.mxu0 %v3097_v49  ;;  %v3185_v49 = vld [vmem:[%s4390_s3 + $0x48] sm:$0xff]  }
  0x30   :  { %756 = vmatpush1.bf16.msra.mxu1 %v3094_v48  ;;  %687 = vmatprep.subr.bf16.mxu0 %v3098_v50  ;;  %v3184_v48 = vld [vmem:[%s4390_s3 + $0x10] sm:$0xff]   ;;  %v3186_v50 = vld [vmem:[%s4390_s3 + $0x8] sm:$0xff]  }
  0x31   :  { %757 = vmatprep.subr.bf16.mxu1 %v3102_v52  ;;  %v3188_v52 = vld [vmem:[%s4390_s3] sm:$0xff]  }
  0x33   :  { %688 = vmatpush2.bf16.msra.mxu0 %v3103_v54  ;;  %v3190_v54 = vld [vmem:[%s4390_s3 + $0xb8] sm:$0xff]  }
  0x34   :  { %758 = vmatpush1.bf16.msra.mxu1 %v3100_v53  ;;  %689 = vmatprep.subr.bf16.mxu0 %v3104_v55  ;;  %v3189_v53 = vld [vmem:[%s4390_s3 + $0xf8] sm:$0xff]   ;;  %v3191_v55 = vld [vmem:[%s4390_s3 + $0xf0] sm:$0xff]  }
  0x35   :  { %759 = vmatprep.subr.bf16.mxu1 %v3108_v56  ;;  %v3192_v56 = vld [vmem:[%s4390_s3 + $0xb0] sm:$0xff]  }
  0x37   :  { %690 = vmatpush2.bf16.msra.mxu0 %v3109_v58  ;;  %v3194_v58 = vld [vmem:[%s4390_s3 + $0xa8] sm:$0xff]  }
  0x38   :  { %760 = vmatpush1.bf16.msra.mxu1 %v3106_v57  ;;  %691 = vmatprep.subr.bf16.mxu0 %v3110_v59  ;;  %v3193_v57 = vld [vmem:[%s4390_s3 + $0xe8] sm:$0xff]   ;;  %v3195_v59 = vld [vmem:[%s4390_s3 + $0xe0] sm:$0xff]  }
  0x39   :  { %761 = vmatprep.subr.bf16.mxu1 %v3114_v60  ;;  %v3196_v60 = vld [vmem:[%s4390_s3 + $0xa0] sm:$0xff]  }
  0x3b   :  { %692 = vmatpush2.bf16.msra.mxu0 %v3115_v62  ;;  %v3198_v62 = vld [vmem:[%s4390_s3 + $0x98] sm:$0xff]  }
  0x3c   :  { %762 = vmatpush1.bf16.msra.mxu1 %v3112_v61  ;;  %693 = vmatprep.subr.bf16.mxu0 %v3116_v63  ;;  %v3197_v61 = vld [vmem:[%s4390_s3 + $0xd8] sm:$0xff]   ;;  %v3199_v63 = vld [vmem:[%s4390_s3 + $0xd0] sm:$0xff]  }
  0x3d   :  { %763 = vmatprep.subr.bf16.mxu1 %v3120_v0  ;;  %v3200_v0 = vld [vmem:[%s4390_s3 + $0x90] sm:$0xff]  }
  0x3f   :  { %694 = vmatpush2.bf16.msra.mxu0 %v3121_v3  ;;  %v3202_v3 = vld [vmem:[%s4390_s3 + $0x88] sm:$0xff]  }
  0x40   :  { %764 = vmatpush1.bf16.msra.mxu1 %v3118_v2  ;;  %792 = vmatprep.subr.bf16.mxu0 %v3130_v5  ;;  %v3201_v2 = vld [vmem:[%s4390_s3 + $0xc8] sm:$0xff]   ;;  %v3204_v5 = vld [vmem:[%s4390_s3 + $0x80] sm:$0xff]  }
  0x41   :  { %765 = vmatprep.subr.bf16.mxu1 %v3127_v4  ;;  %v3203_v4 = vld [vmem:[%s4390_s3 + $0xc0] sm:$0xff]  }
  0x42   :  { %696 = vmatmul.mubr.bf16.vlgmr.msra.gmra.mxu0 %v3681_v6 }
  0x43   :  { %793 = vmatpush1.bf16.msra.mxu0 %v3128_v8  ;;  %824 = vmatprep.mubr.bf16.mxu0 %v3397_v1 }
  0x44   :  { %766 = vmatpush2.bf16.msra.mxu1 %v3125_v7  ;;  %794 = vmatprep.subr.bf16.mxu0 %v3136_v10 }
  0x45   :  { %767 = vmatprep.subr.bf16.mxu1 %v3133_v9 }
  0x47   :  { %795 = vmatpush1.bf16.msra.mxu0 %v3134_v12 }
  0x48   :  { %768 = vmatpush2.bf16.msra.mxu1 %v3131_v11  ;;  %796 = vmatprep.subr.bf16.mxu0 %v3142_v14  ;;  %v145_v11 = vld [vmem:[%s4391_s2] sm:$0xf] }
  0x49   :  { %769 = vmatprep.subr.bf16.mxu1 %v3139_v13 }
  0x4b   :  { %797 = vmatpush1.bf16.msra.mxu0 %v3140_v16 }
  0x4c   :  { %770 = vmatpush2.bf16.msra.mxu1 %v3137_v15  ;;  %798 = vmatprep.subr.bf16.mxu0 %v3148_v18 }
  0x4d   :  { %771 = vmatprep.subr.bf16.mxu1 %v3145_v17 }
  0x4f   :  { %799 = vmatpush1.bf16.msra.mxu0 %v3146_v20 }
  0x50   :  { %772 = vmatpush2.bf16.msra.mxu1 %v3143_v19  ;;  %800 = vmatprep.subr.bf16.mxu0 %v3154_v22 }
  0x51   :  { %773 = vmatprep.subr.bf16.mxu1 %v3151_v21 }
  0x53   :  { %801 = vmatpush1.bf16.msra.mxu0 %v3152_v24 }
  0x54   :  { %774 = vmatpush2.bf16.msra.mxu1 %v3149_v23  ;;  %802 = vmatprep.subr.bf16.mxu0 %v3160_v26 }
  0x55   :  { %775 = vmatprep.subr.bf16.mxu1 %v3157_v25 }
  0x57   :  { %803 = vmatpush1.bf16.msra.mxu0 %v3158_v28 }
  0x58   :  { %776 = vmatpush2.bf16.msra.mxu1 %v3155_v27  ;;  %804 = vmatprep.subr.bf16.mxu0 %v3166_v30 }
  0x59   :  { %777 = vmatprep.subr.bf16.mxu1 %v3163_v29 }
  0x5b   :  { %805 = vmatpush1.bf16.msra.mxu0 %v3164_v32 }
  0x5c   :  { %778 = vmatpush2.bf16.msra.mxu1 %v3161_v31  ;;  %806 = vmatprep.subr.bf16.mxu0 %v3172_v34 }
  0x5d   :  { %779 = vmatprep.subr.bf16.mxu1 %v3169_v33 }
  0x5f   :  { %807 = vmatpush1.bf16.msra.mxu0 %v3170_v37 }
  0x60   :  { %780 = vmatpush2.bf16.msra.mxu1 %v3167_v36  ;;  %2876 = vmatprep.subr.bf16.mxu0 %v3173_v38 }
  0x61   :  { %2898 = vmatprep.subr.bf16.mxu1 %v3189_v53 }
  0x62   :  { %825 = vmatmul.mubr.bf16.vlgmr.msra.gmra.mxu0 %v3576_v35  ;;  %v3177_v35 = vld [vmem:[%s4390_s3 + $0x68] sm:$0xff]  }
  0x63   :  { %782 = vmatmul.mubr.bf16.vlgmr.msra.gmra.mxu1 %v3681_v6  ;;  %2877 = vmatpush3.bf16.msra.mxu0 %v3174_v39  ;;  %v147_v6 = vlaneseq }
  0x64   :  { %2878 = vmatprep.subr.bf16.mxu0 %v3175_v40  ;;  %2899 = vmatpush3.bf16.msra.mxu1 %v3190_v54 }
  0x65   :  { %2900 = vmatprep.subr.bf16.mxu1 %v3191_v55  ;;  %v3873_v7 = vshrl.u32 %v147_v6, 7  ;;  %v3212_v6 = vld [vmem:[%s4392_s5] sm:$0xff]  }
  0x67   :  { %2879 = vmatpush3.bf16.msra.mxu0 %v3176_v41  ;;  %v3876_v8 = vsub.s32 1, %v3873_v7  ;;  %v3879_v10 = vsub.s32 0, %v3873_v7  ;;  %v161_v36 = vsub.s32 3, %v3873_v7  ;;  %v3888_v37 = vsub.s32 2, %v3873_v7 }
  0x68   :  { %2880 = vmatprep.subr.bf16.mxu0 %v3177_v35  ;;  %2901 = vmatpush3.bf16.msra.mxu1 %v3192_v56 }
  0x69   :  { %2902 = vmatprep.subr.bf16.mxu1 %v3193_v57  ;;  %v154_v12 = vrot.slane %v145_v11, %v3876_v8  ;;  %v150_v14 = vrot.slane %v145_v11, %v3879_v10  ;;  %v162_v38 = vrot.slane %v145_v11, %v161_v36  ;;  %v158_v39 = vrot.slane %v145_v11, %v3888_v37  ;;  %v3214_v11 = vld [vmem:[%s4393_s7 + $0x30] sm:$0xff]  }
  0x6b   :  { %2881 = vmatpush3.bf16.msra.mxu0 %v3178_v42 }
  0x6c   :  { %2882 = vmatprep.subr.bf16.mxu0 %v3179_v43  ;;  %2903 = vmatpush3.bf16.msra.mxu1 %v3194_v58 }
  0x6d   :  { %2904 = vmatprep.subr.bf16.mxu1 %v3195_v59 }
  0x6f   :  { %2883 = vmatpush3.bf16.msra.mxu0 %v3180_v44 }
  0x70   :  { %2884 = vmatprep.subr.bf16.mxu0 %v3181_v45  ;;  %2905 = vmatpush3.bf16.msra.mxu1 %v3196_v60 }
  0x71   :  { %2906 = vmatprep.subr.bf16.mxu1 %v3197_v61  ;;  %v3398_v61 = vmov 0.0  }
  0x73   :  { %2885 = vmatpush3.bf16.msra.mxu0 %v3182_v46 }
  0x74   :  { %2886 = vmatprep.subr.bf16.mxu0 %v3183_v47  ;;  %2907 = vmatpush3.bf16.msra.mxu1 %v3198_v62  ;;  %v3205_v62 = vld [vmem:[%s4392_s5 + $0x38] sm:$0xff]  }
  0x75   :  { %2908 = vmatprep.subr.bf16.mxu1 %v3199_v63  ;;  %v3206_v63 = vld [vmem:[%s4392_s5 + $0x30] sm:$0xff]  }
  0x77   :  { %2887 = vmatpush3.bf16.msra.mxu0 %v3184_v48 }
  0x78   :  { %2888 = vmatprep.subr.bf16.mxu0 %v3185_v49  ;;  %2909 = vmatpush3.bf16.msra.mxu1 %v3200_v0  ;;  %v3207_v0 = vld [vmem:[%s4392_s5 + $0x28] sm:$0xff]  }
  0x79   :  { %2910 = vmatprep.subr.bf16.mxu1 %v3201_v2  ;;  %v3208_v2 = vld [vmem:[%s4392_s5 + $0x20] sm:$0xff]  }
  0x7b   :  { %2889 = vmatpush3.bf16.msra.mxu0 %v3186_v50 }
  0x7c   :  { %2890 = vmatprep.subr.bf16.mxu0 %v3187_v51  ;;  %2911 = vmatpush3.bf16.msra.mxu1 %v3202_v3  ;;  %v3209_v3 = vld [vmem:[%s4392_s5 + $0x18] sm:$0xff]  }
  0x7d   :  { %2912 = vmatprep.subr.bf16.mxu1 %v3203_v4  ;;  %v3210_v4 = vld [vmem:[%s4392_s5 + $0x10] sm:$0xff]  }
  0x7f   :  { %2891 = vmatpush3.bf16.msra.mxu0 %v3188_v52 }
  0x80   :  { %2913 = vmatpush3.bf16.msra.mxu1 %v3204_v5  ;;  %2982 = vmatprep.subr.bf16.mxu0 %v3398_v61  ;;  %v3211_v5 = vld [vmem:[%s4392_s5 + $0x8] sm:$0xff]  }
  0x81   :  { %3002 = vmatprep.subr.bf16.mxu1 %v3398_v61 }
  0xe3   :  { %v740_v9 = vpop.f32.mrf.mxu1 }
  0xe5   :  { %v742_v13 = vpop.f32.mrf.mxu1 }
  0xe7   :  { %v744_v18 = vpop.f32.mrf.mxu1 }
  0xe9   :  { %v746_v26 = vpop.f32.mrf.mxu1 }
 0x102   :  { %v697_v15 = vpop.f32.mrf.mxu0 }
 0x103   :  { %v698_v19 = vadd.f32 %v697_v15, %v150_v14 }
 0x104   :  { %v699_v16 = vpop.f32.mrf.mxu0 }
 0x105   :  { %v700_v17 = vadd.f32 %v699_v16, %v154_v12  ;;  %v741_v27 = vadd.f32 %v740_v9, %v698_v19  ;;  %v3213_v9 = vld [vmem:[%s4393_s7 + $0x38] sm:$0xff]  }
 0x106   :  { %v701_v20 = vpop.f32.mrf.mxu0 }
 0x107   :  { %v702_v21 = vadd.f32 %v701_v20, %v150_v14  ;;  %v743_v23 = vadd.f32 %v742_v13, %v700_v17  ;;  %v835_v32 = vmax.f32 %v741_v27, 0.0  ;;  %v3216_v13 = vld [vmem:[%s4393_s7 + $0x20] sm:$0xff]   ;;  %v3217_v14 = vld [vmem:[%s4393_s7 + $0x18] sm:$0xff]  }
 0x108   :  { %v703_v22 = vpop.f32.mrf.mxu0 }
 0x109   :  { %v745_v24 = vadd.f32 %v744_v18, %v702_v21  ;;  %v704_v25 = vadd.f32 %v703_v22, %v154_v12  ;;  %v836_v30 = vmax.f32 %v743_v23, 0.0  ;;  %v3215_v12 = vld [vmem:[%s4393_s7 + $0x28] sm:$0xff]   ;;  %v2689_v21 = vld [vmem:[%s4394_s4] ss:$0 sm:$0xff] }
 0x10b   :  { %v747_v28 = vadd.f32 %v746_v26, %v704_v25  ;;  %v839_v29 = vmax.f32 %v745_v24, 0.0 }
 0x10d   :  { %v840_v31 = vmax.f32 %v747_v28, 0.0  ;;  %v843_v34 = vpack.c.bf16 %v839_v29, %v835_v32 }
 0x10f   :  { %v844_v33 = vpack.c.bf16 %v840_v31, %v836_v30 }
 0x111   :  { %1142 = vmatprep.mubr.bf16.mxu0 %v844_v33 }
 0x112   :  { %1143 = vmatmul.mubr.bf16.vlgmr.msra.gmra.mxu0 %v843_v34 }
 0x113   :  { %2983 = vmatpush3.bf16.msra.mxu0 %v3205_v62  ;;  %2998 = vmatprep.mubr.msk.bf16.mxu0 %vm3399_vm0, %v3398_v61  ;;  %v3224_v62 = vld [vmem:[%s4395_s9 + $0xe8] ss:$16 sps:$4 sm:$0xff]  }
 0x114   :  { %2984 = vmatprep.subr.bf16.mxu0 %v3398_v61 }
 0x117   :  { %2985 = vmatpush3.bf16.msra.mxu0 %v3206_v63 }
 0x118   :  { %2986 = vmatprep.subr.bf16.mxu0 %v3398_v61 }
 0x11b   :  { %2987 = vmatpush3.bf16.msra.mxu0 %v3207_v0  ;;  %v3232_v0 = vld [vmem:[%s4395_s9 + $0xcc] ss:$16 sps:$4 sm:$0xff]  }
 0x11c   :  { %2988 = vmatprep.subr.bf16.mxu0 %v3398_v61 }
 0x11f   :  { %2989 = vmatpush3.bf16.msra.mxu0 %v3208_v2  ;;  %v3230_v2 = vld [vmem:[%s4395_s9 + $0xc8] ss:$16 sps:$4 sm:$0xff]  }
 0x120   :  { %2990 = vmatprep.subr.bf16.mxu0 %v3398_v61 }
 0x122   :  { %v826_v41 = vpop.f32.mrf.mxu0 }
 0x123   :  { %v783_v40 = vpop.f32.mrf.mxu1  ;;  %2991 = vmatpush3.bf16.msra.mxu0 %v3209_v3  ;;  %v3238_v3 = vld [vmem:[%s4395_s9 + $0xac] ss:$16 sps:$4 sm:$0xff]  }
 0x124   :  { %v828_v42 = vpop.f32.mrf.mxu0  ;;  %v784_v44 = vadd.f32 %v783_v40, %v158_v39  ;;  %2992 = vmatprep.subr.bf16.mxu0 %v3398_v61  ;;  %v3220_v40 = vld [vmem:[%s4393_s7] sm:$0xff]  }
 0x125   :  { %v785_v35 = vpop.f32.mrf.mxu1 }
 0x126   :  { %v786_v43 = vadd.f32 %v785_v35, %v162_v38  ;;  %v830_v46 = vpop.f32.mrf.mxu0  ;;  %v827_v52 = vadd.f32 %v826_v41, %v784_v44  ;;  %v3221_v41 = vld [vmem:[%s4395_s9 + $0xe0] ss:$16 sps:$4 sm:$0xff]   ;;  %v3223_v35 = vld [vmem:[%s4395_s9 + $0xe4] ss:$16 sps:$4 sm:$0xff]  }
 0x127   :  { %v787_v45 = vpop.f32.mrf.mxu1  ;;  %2993 = vmatpush3.bf16.msra.mxu0 %v3210_v4  ;;  %v3227_v44 = vld [vmem:[%s4395_s9 + $0xc0] ss:$16 sps:$4 sm:$0xff]   ;;  %v3236_v4 = vld [vmem:[%s4395_s9 + $0xa8] ss:$16 sps:$4 sm:$0xff]  }
 0x128   :  { %v788_v47 = vadd.f32 %v787_v45, %v158_v39  ;;  %v829_v49 = vadd.f32 %v828_v42, %v786_v43  ;;  %v832_v53 = vpop.f32.mrf.mxu0  ;;  %v837_v58 = vmax.f32 %v827_v52, 0.0  ;;  %2994 = vmatprep.subr.bf16.mxu0 %v3398_v61  ;;  %v3219_v39 = vld [vmem:[%s4393_s7 + $0x8] sm:$0xff]   ;;  %v3229_v43 = vld [vmem:[%s4395_s9 + $0xc4] ss:$16 sps:$4 sm:$0xff]   ;;  %v3251_v52 = vld [vmem:[%s4395_s9 + $0x40] ss:$16 sps:$4 sm:$0xff]  }
 0x129   :  { %v789_v48 = vpop.f32.mrf.mxu1  ;;  %v3226_v42 = vld [vmem:[%s4395_s9 + $0xec] ss:$16 sps:$4 sm:$0xff]   ;;  %v3235_v45 = vld [vmem:[%s4395_s9 + $0xa4] ss:$16 sps:$4 sm:$0xff]  }
 0x12a   :  { %v831_v50 = vadd.f32 %v830_v46, %v788_v47  ;;  %v790_v51 = vadd.f32 %v789_v48, %v162_v38  ;;  %v838_v56 = vmax.f32 %v829_v49, 0.0  ;;  %v3218_v38 = vld [vmem:[%s4393_s7 + $0x10] sm:$0xff]  }
 0x12b   :  { %2995 = vmatpush3.bf16.msra.mxu0 %v3211_v5  ;;  %v3233_v46 = vld [vmem:[%s4395_s9 + $0xa0] ss:$16 sps:$4 sm:$0xff]   ;;  %v3241_v47 = vld [vmem:[%s4395_s9 + $0x84] ss:$16 sps:$4 sm:$0xff]   ;;  %v3244_v5 = vld [vmem:[%s4395_s9 + $0x8c] ss:$16 sps:$4 sm:$0xff]  }
 0x12c   :  { %v833_v54 = vadd.f32 %v832_v53, %v790_v51  ;;  %v841_v55 = vmax.f32 %v831_v50, 0.0  ;;  %2996 = vmatprep.subr.bf16.mxu0 %v3398_v61  ;;  %v3239_v48 = vld [vmem:[%s4395_s9 + $0x80] ss:$16 sps:$4 sm:$0xff]   ;;  %v3247_v49 = vld [vmem:[%s4395_s9 + $0x64] ss:$16 sps:$4 sm:$0xff]  }
 0x12d   :  { %v3245_v50 = vld [vmem:[%s4395_s9 + $0x60] ss:$16 sps:$4 sm:$0xff]   ;;  %v3253_v51 = vld [vmem:[%s4395_s9 + $0x44] ss:$16 sps:$4 sm:$0xff]  }
 0x12e   :  { %v842_v57 = vmax.f32 %v833_v54, 0.0  ;;  %v845_v60 = vpack.c.bf16 %v841_v55, %v837_v58  ;;  %v2722_v53 = vld [vmem:[%s4396_s6] ss:$0 sm:$0xff] }
 0x12f   :  { %2997 = vmatpush3.bf16.msra.mxu0 %v3212_v6  ;;  %v3250_v6 = vld [vmem:[%s4395_s9 + $0x6c] ss:$16 sps:$4 sm:$0xff]  }
 0x130   :  { %v846_v59 = vpack.c.bf16 %v842_v57, %v838_v56  ;;  %1639 = vmatprep.subr.bf16.mxu0 %v3223_v35  ;;  %v3283_v35 = vld [vmem:[%s4397_s11 + $0x7c] ss:$12 sps:$4 sm:$0xff]  }
 0x132   :  { %1183 = vmatprep.mubr.bf16.mxu1 %v846_v59 }
 0x133   :  { %1184 = vmatmul.mubr.bf16.vlgmr.msra.gmra.mxu1 %v845_v60 }
 0x134   :  { %3018 = vmatprep.mubr.msk.bf16.mxu1 %vm3399_vm0, %v3398_v61  ;;  %3003 = vmatpush3.bf16.msra.mxu1 %v3213_v9  ;;  %v3248_v9 = vld [vmem:[%s4395_s9 + $0x68] ss:$16 sps:$4 sm:$0xff]  }
 0x135   :  { %3004 = vmatprep.subr.bf16.mxu1 %v3398_v61 }
 0x138   :  { %3005 = vmatpush3.bf16.msra.mxu1 %v3214_v11  ;;  %v3256_v11 = vld [vmem:[%s4395_s9 + $0x4c] ss:$16 sps:$4 sm:$0xff]  }
 0x139   :  { %3006 = vmatprep.subr.bf16.mxu1 %v3398_v61 }
 0x13c   :  { %3007 = vmatpush3.bf16.msra.mxu1 %v3215_v12  ;;  %v3254_v12 = vld [vmem:[%s4395_s9 + $0x48] ss:$16 sps:$4 sm:$0xff]  }
 0x13d   :  { %3008 = vmatprep.subr.bf16.mxu1 %v3398_v61 }
 0x140   :  { %3009 = vmatpush3.bf16.msra.mxu1 %v3216_v13  ;;  %v3259_v13 = vld [vmem:[%s4395_s9 + $0x24] ss:$16 sps:$4 sm:$0xff]  }
 0x141   :  { %3010 = vmatprep.subr.bf16.mxu1 %v3398_v61 }
 0x144   :  { %3011 = vmatpush3.bf16.msra.mxu1 %v3217_v14  ;;  %v3262_v14 = vld [vmem:[%s4395_s9 + $0x2c] ss:$16 sps:$4 sm:$0xff]  }
 0x145   :  { %3012 = vmatprep.subr.bf16.mxu1 %v3398_v61 }
 0x148   :  { %3013 = vmatpush3.bf16.msra.mxu1 %v3218_v38  ;;  %v3277_v38 = vld [vmem:[%s4397_s11 + $0x94] ss:$12 sps:$4 sm:$0xff]  }
 0x149   :  { %3014 = vmatprep.subr.bf16.mxu1 %v3398_v61 }
 0x14c   :  { %3015 = vmatpush3.bf16.msra.mxu1 %v3219_v39  ;;  %v3280_v39 = vld [vmem:[%s4397_s11 + $0x214] ss:$12 sps:$4 sm:$0xff]  }
 0x14d   :  { %3016 = vmatprep.subr.bf16.mxu1 %v3398_v61 }
 0x150   :  { %3017 = vmatpush3.bf16.msra.mxu1 %v3220_v40  ;;  %v3275_v40 = vld [vmem:[%s4397_s11 + $0x90] ss:$12 sps:$4 sm:$0xff]  }
 0x151   :  { %1682 = vmatprep.subr.bf16.mxu1 %v3226_v42  ;;  %v3286_v42 = vld [vmem:[%s4397_s11 + $0x1fc] ss:$12 sps:$4 sm:$0xff]  }
 0x1d2   :  { %v2892_v15 = vpop.f32.mrf.mxu0 }
 0x1d4   :  { %v2893_v16 = vpop.f32.mrf.mxu0 }
 0x1d5   :  { %v2894_v20 = vadd.f32 %v2893_v16, %v2892_v15  ;;  %v3257_v15 = vld [vmem:[%s4395_s9 + $0x20] ss:$16 sps:$4 sm:$0xff]   ;;  %v3260_v16 = vld [vmem:[%s4395_s9 + $0x28] ss:$16 sps:$4 sm:$0xff]  }
 0x1d6   :  { %v2895_v17 = vpop.f32.mrf.mxu0 }
 0x1d7   :  { %v1145_v26 = vadd.f32 %v2894_v20, %v2689_v21  ;;  %v3266_v20 = vld [vmem:[%s4395_s9 + $0x8] ss:$16 sps:$4 sm:$0xff]  }
 0x1d8   :  { %v2896_v18 = vpop.f32.mrf.mxu0 }
 0x1d9   :  { %v2897_v23 = vadd.f32 %v2896_v18, %v2895_v17  ;;  %v3265_v17 = vld [vmem:[%s4395_s9 + $0x4] ss:$16 sps:$4 sm:$0xff]   ;;  %v3268_v18 = vld [vmem:[%s4395_s9 + $0xc] ss:$16 sps:$4 sm:$0xff]  }
 0x1db   :  { %v1148_v28 = vadd.f32 %v2897_v23, %v2689_v21  ;;  %v3271_v21 = vld [vmem:[%s4397_s11 + $0xac] ss:$12 sps:$4 sm:$0xff]   ;;  %v2731_v23 = vld [vmem:[%s4398_s8] ss:$0 sm:$0xff] }
 0x1f3   :  { %v2914_v19 = vpop.f32.mrf.mxu1 }
 0x1f5   :  { %v2915_v22 = vpop.f32.mrf.mxu1 }
 0x1f6   :  { %v2916_v24 = vadd.f32 %v2915_v22, %v2914_v19  ;;  %v3263_v19 = vld [vmem:[%s4395_s9] ss:$16 sps:$4 sm:$0xff]   ;;  %v3274_v22 = vld [vmem:[%s4397_s11 + $0x22c] ss:$12 sps:$4 sm:$0xff]  }
 0x1f7   :  { %v2917_v25 = vpop.f32.mrf.mxu1 }
 0x1f8   :  { %v1186_v29 = vadd.f32 %v2916_v24, %v1145_v26 }
 0x1f9   :  { %v2918_v27 = vpop.f32.mrf.mxu1 }
 0x1fa   :  { %v2919_v30 = vadd.f32 %v2918_v27, %v2917_v25  ;;  %v1192_v32 = vmax.f32 %v1186_v29, 0.0 }
 0x1fc   :  { %v1189_v31 = vadd.f32 %v2919_v30, %v1148_v28 }
 0x1fe   :  { %v1193_v33 = vmax.f32 %v1189_v31, 0.0 }
 0x200   :  { %v1194_v34 = vpack.c.bf16 %v1193_v33, %v1192_v32  ;;  %v3269_v32 = vld [vmem:[%s4397_s11 + $0xa8] ss:$12 sps:$4 sm:$0xff]  }
 0x201   :  { %v3272_v33 = vld [vmem:[%s4397_s11 + $0x228] ss:$12 sps:$4 sm:$0xff]  }
 0x202   :  { %2999 = vmatmul.mubr.bf16.vlgmr.msra.gmra.mxu0 %v1194_v34 }
 0x203   :  { %1671 = vmatprep.mubr.bf16.mxu0 %v3397_v1  ;;  %1640 = vmatpush1.bf16.msra.mxu0 %v3221_v41  ;;  %v3278_v41 = vld [vmem:[%s4397_s11 + $0x210] ss:$12 sps:$4 sm:$0xff]  }
 0x204   :  { %1641 = vmatprep.subr.bf16.mxu0 %v3229_v43  ;;  %v3281_v43 = vld [vmem:[%s4397_s11 + $0x78] ss:$12 sps:$4 sm:$0xff]  }
 0x207   :  { %1642 = vmatpush1.bf16.msra.mxu0 %v3227_v44  ;;  %v3284_v44 = vld [vmem:[%s4397_s11 + $0x1f8] ss:$12 sps:$4 sm:$0xff]  }
 0x208   :  { %1643 = vmatprep.subr.bf16.mxu0 %v3235_v45  ;;  %v3289_v45 = vld [vmem:[%s4397_s11 + $0x64] ss:$12 sps:$4 sm:$0xff]  }
 0x20b   :  { %1644 = vmatpush1.bf16.msra.mxu0 %v3233_v46  ;;  %v3292_v46 = vld [vmem:[%s4397_s11 + $0x1e4] ss:$12 sps:$4 sm:$0xff]  }
 0x20c   :  { %1645 = vmatprep.subr.bf16.mxu0 %v3241_v47  ;;  %v3287_v47 = vld [vmem:[%s4397_s11 + $0x60] ss:$12 sps:$4 sm:$0xff]  }
 0x20f   :  { %1646 = vmatpush1.bf16.msra.mxu0 %v3239_v48  ;;  %v3290_v48 = vld [vmem:[%s4397_s11 + $0x1e0] ss:$12 sps:$4 sm:$0xff]  }
 0x210   :  { %1647 = vmatprep.subr.bf16.mxu0 %v3247_v49  ;;  %v3295_v49 = vld [vmem:[%s4397_s11 + $0x4c] ss:$12 sps:$4 sm:$0xff]  }
 0x213   :  { %1648 = vmatpush1.bf16.msra.mxu0 %v3245_v50  ;;  %v3298_v50 = vld [vmem:[%s4397_s11 + $0x1cc] ss:$12 sps:$4 sm:$0xff]  }
 0x214   :  { %1649 = vmatprep.subr.bf16.mxu0 %v3253_v51  ;;  %v3293_v51 = vld [vmem:[%s4397_s11 + $0x48] ss:$12 sps:$4 sm:$0xff]  }
 0x217   :  { %1650 = vmatpush1.bf16.msra.mxu0 %v3251_v52  ;;  %v3296_v52 = vld [vmem:[%s4397_s11 + $0x1c8] ss:$12 sps:$4 sm:$0xff]  }
 0x218   :  { %1651 = vmatprep.subr.bf16.mxu0 %v3259_v13  ;;  %v3334_v13 = vld [vmem:[%s4397_s11 + $0x2bc] ss:$12 sps:$4 sm:$0xff]  }
 0x21b   :  { %1652 = vmatpush1.bf16.msra.mxu0 %v3257_v15  ;;  %v3332_v15 = vld [vmem:[%s4397_s11 + $0x2b8] ss:$12 sps:$4 sm:$0xff]  }
 0x21c   :  { %1653 = vmatprep.subr.bf16.mxu0 %v3265_v17  ;;  %v3340_v17 = vld [vmem:[%s4397_s11 + $0x2a4] ss:$12 sps:$4 sm:$0xff]  }
 0x21f   :  { %1654 = vmatpush1.bf16.msra.mxu0 %v3263_v19  ;;  %v3338_v19 = vld [vmem:[%s4397_s11 + $0x2a0] ss:$12 sps:$4 sm:$0xff]  }
 0x220   :  { %2394 = vmatprep.subr.bf16.mxu0 %v3271_v21  ;;  %v3346_v21 = vld [vmem:[%s4397_s11 + $0x28c] ss:$12 sps:$4 sm:$0xff]  }
 0x2c2   :  { %v1300_v54 = vpop.f32.mrf.mxu0 }
 0x2c3   :  { %v1301_v56 = vadd.f32 %v2722_v53, %v1300_v54  ;;  %v3304_v54 = vld [vmem:[%s4397_s11 + $0x1b4] ss:$12 sps:$4 sm:$0xff]  }
 0x2c4   :  { %v3000_v55 = vpop.f32.mrf.mxu0 }
 0x2c5   :  { %v1307_v60 = vmax.f32 %v1301_v56, 0.0  ;;  %v3299_v55 = vld [vmem:[%s4397_s11 + $0x30] ss:$12 sps:$4 sm:$0xff]  }
 0x2c6   :  { %v1303_v57 = vpop.f32.mrf.mxu0  ;;  %v3302_v56 = vld [vmem:[%s4397_s11 + $0x1b0] ss:$12 sps:$4 sm:$0xff]  }
 0x2c7   :  { %v1304_v58 = vadd.f32 %v2722_v53, %v1303_v57  ;;  %v3301_v53 = vld [vmem:[%s4397_s11 + $0x34] ss:$12 sps:$4 sm:$0xff]   ;;  %v3307_v57 = vld [vmem:[%s4397_s11 + $0x1c] ss:$12 sps:$4 sm:$0xff]  }
 0x2c8   :  { %v3001_v59 = vpop.f32.mrf.mxu0 }
 0x2c9   :  { %v1308_v61 = vmax.f32 %v1304_v58, 0.0  ;;  %v3310_v58 = vld [vmem:[%s4397_s11 + $0x19c] ss:$12 sps:$4 sm:$0xff]   ;;  %v3305_v59 = vld [vmem:[%s4397_s11 + $0x18] ss:$12 sps:$4 sm:$0xff]  }
 0x2cb   :  { %v1309_v63 = vpack.c.bf16 %v1308_v61, %v1307_v60  ;;  %v3308_v60 = vld [vmem:[%s4397_s11 + $0x198] ss:$12 sps:$4 sm:$0xff]  }
 0x2cc   :  { %v3313_v61 = vld [vmem:[%s4397_s11 + $0x4] ss:$12 sps:$4 sm:$0xff]  }
 0x2cd   :  { %3019 = vmatmul.mubr.bf16.vlgmr.msra.gmra.mxu1 %v1309_v63  ;;  %v3311_v63 = vld [vmem:[%s4397_s11] ss:$12 sps:$4 sm:$0xff]  }
 0x2ce   :  { %1683 = vmatpush1.bf16.msra.mxu1 %v3224_v62  ;;  %1714 = vmatprep.mubr.bf16.mxu1 %v3397_v1  ;;  %v3242_v1 = vld [vmem:[%s4395_s9 + $0x88] ss:$16 sps:$4 sm:$0xff]   ;;  %v3316_v62 = vld [vmem:[%s4397_s11 + $0x184] ss:$12 sps:$4 sm:$0xff]  }
 0x2cf   :  { %1684 = vmatprep.subr.bf16.mxu1 %v3232_v0  ;;  %v3314_v0 = vld [vmem:[%s4397_s11 + $0x180] ss:$12 sps:$4 sm:$0xff]  }
 0x2d2   :  { %1685 = vmatpush1.bf16.msra.mxu1 %v3230_v2  ;;  %v3319_v2 = vld [vmem:[%s4397_s11 + $0x16c] ss:$12 sps:$4 sm:$0xff]  }
 0x2d3   :  { %1686 = vmatprep.subr.bf16.mxu1 %v3238_v3  ;;  %v3322_v3 = vld [vmem:[%s4397_s11 + $0x2ec] ss:$12 sps:$4 sm:$0xff]  }
 0x2d6   :  { %1687 = vmatpush1.bf16.msra.mxu1 %v3236_v4  ;;  %v3317_v4 = vld [vmem:[%s4397_s11 + $0x168] ss:$12 sps:$4 sm:$0xff]  }
 0x2d7   :  { %1688 = vmatprep.subr.bf16.mxu1 %v3244_v5  ;;  %v3320_v5 = vld [vmem:[%s4397_s11 + $0x2e8] ss:$12 sps:$4 sm:$0xff]  }
 0x2da   :  { %1689 = vmatpush1.bf16.msra.mxu1 %v3242_v1  ;;  %v3325_v1 = vld [vmem:[%s4397_s11 + $0x154] ss:$12 sps:$4 sm:$0xff]  }
 0x2db   :  { %1690 = vmatprep.subr.bf16.mxu1 %v3250_v6  ;;  %v3328_v6 = vld [vmem:[%s4397_s11 + $0x2d4] ss:$12 sps:$4 sm:$0xff]  }
 0x2de   :  { %1691 = vmatpush1.bf16.msra.mxu1 %v3248_v9  ;;  %v3323_v9 = vld [vmem:[%s4397_s11 + $0x150] ss:$12 sps:$4 sm:$0xff]  }
 0x2df   :  { %1692 = vmatprep.subr.bf16.mxu1 %v3256_v11  ;;  %v3326_v11 = vld [vmem:[%s4397_s11 + $0x2d0] ss:$12 sps:$4 sm:$0xff]  }
 0x2e2   :  { %1693 = vmatpush1.bf16.msra.mxu1 %v3254_v12  ;;  %v3331_v12 = vld [vmem:[%s4397_s11 + $0x13c] ss:$12 sps:$4 sm:$0xff]  }
 0x2e3   :  { %1694 = vmatprep.subr.bf16.mxu1 %v3262_v14  ;;  %v3329_v14 = vld [vmem:[%s4397_s11 + $0x138] ss:$12 sps:$4 sm:$0xff]  }
 0x2e6   :  { %1695 = vmatpush1.bf16.msra.mxu1 %v3260_v16  ;;  %v3337_v16 = vld [vmem:[%s4397_s11 + $0x124] ss:$12 sps:$4 sm:$0xff]  }
 0x2e7   :  { %1696 = vmatprep.subr.bf16.mxu1 %v3268_v18  ;;  %v3335_v18 = vld [vmem:[%s4397_s11 + $0x120] ss:$12 sps:$4 sm:$0xff]  }
 0x2ea   :  { %1697 = vmatpush1.bf16.msra.mxu1 %v3266_v20  ;;  %v3343_v20 = vld [vmem:[%s4397_s11 + $0x10c] ss:$12 sps:$4 sm:$0xff]  }
 0x2eb   :  { %2437 = vmatprep.subr.bf16.mxu1 %v3274_v22  ;;  %v3341_v22 = vld [vmem:[%s4397_s11 + $0x108] ss:$12 sps:$4 sm:$0xff]  }
 0x38d   :  { %v1415_v24 = vpop.f32.mrf.mxu1 }
 0x38e   :  { %v1416_v26 = vadd.f32 %v2731_v23, %v1415_v24  ;;  %v3349_v24 = vld [vmem:[%s4397_s11 + $0xf4] ss:$12 sps:$4 sm:$0xff]  }
 0x38f   :  { %v3020_v25 = vpop.f32.mrf.mxu1 }
 0x390   :  { %v1422_v30 = vmax.f32 %v1416_v26, 0.0  ;;  %v3352_v25 = vld [vmem:[%s4397_s11 + $0x274] ss:$12 sps:$4 sm:$0xff]   ;;  %v3347_v26 = vld [vmem:[%s4397_s11 + $0xf0] ss:$12 sps:$4 sm:$0xff]  }
 0x391   :  { %v1418_v27 = vpop.f32.mrf.mxu1 }
 0x392   :  { %v1419_v28 = vadd.f32 %v2731_v23, %v1418_v27  ;;  %v3344_v23 = vld [vmem:[%s4397_s11 + $0x288] ss:$12 sps:$4 sm:$0xff]   ;;  %v3350_v27 = vld [vmem:[%s4397_s11 + $0x270] ss:$12 sps:$4 sm:$0xff]  }
 0x393   :  { %v3021_v29 = vpop.f32.mrf.mxu1 }
 0x394   :  { %v1423_v31 = vmax.f32 %v1419_v28, 0.0  ;;  %v3355_v28 = vld [vmem:[%s4397_s11 + $0xdc] ss:$12 sps:$4 sm:$0xff]  }
 0x395   :  { %v3358_v29 = vld [vmem:[%s4397_s11 + $0x25c] ss:$12 sps:$4 sm:$0xff]  }
 0x396   :  { %v1424_v34 = vpack.c.bf16 %v1423_v31, %v1422_v30  ;;  %v3353_v30 = vld [vmem:[%s4397_s11 + $0xd8] ss:$12 sps:$4 sm:$0xff]  }
 0x397   :  { %v3356_v31 = vld [vmem:[%s4397_s11 + $0x258] ss:$12 sps:$4 sm:$0xff]  }
 0x398   :  { %1672 = vmatmul.mubr.bf16.vlgmr.msra.gmra.mxu0 %v1424_v34  ;;  %1715 = vmatmul.mubr.bf16.vlgmr.msra.gmra.mxu1 %v1424_v34  ;;  %v3359_v34 = vld [vmem:[%s4397_s11 + $0xc0] ss:$12 sps:$4 sm:$0xff]  }
 0x399   :  { %2395 = vmatpush1.bf16.msra.mxu0 %v3269_v32  ;;  %2438 = vmatpush1.bf16.msra.mxu1 %v3272_v33  ;;  %v3361_v32 = vld [vmem:[%s4397_s11 + $0xc4] ss:$12 sps:$4 sm:$0xff]  }
 0x39a   :  { %2396 = vmatprep.subr.bf16.mxu0 %v3277_v38  ;;  %2439 = vmatprep.subr.bf16.mxu1 %v3280_v39  ;;  %v3364_v33 = vld [vmem:[%s4397_s11 + $0x244] ss:$12 sps:$4 sm:$0xff]   ;;  %v3362_v38 = vld [vmem:[%s4397_s11 + $0x240] ss:$12 sps:$4 sm:$0xff]  }
 0x39b   :  { %v3365_v39 = vld [vmem:[%s4397_s11 + $0x170] ss:$12 sps:$4 sm:$0xff]  }
 0x39d   :  { %2397 = vmatpush1.bf16.msra.mxu0 %v3275_v40  ;;  %2440 = vmatpush1.bf16.msra.mxu1 %v3278_v41  ;;  %v3366_v40 = vld [vmem:[%s4397_s11 + $0x2f0] ss:$12 sps:$4 sm:$0xff]   ;;  %v1457_v41 = vld [vmem:[%s4399_s10] sm:$0xf] }
 0x39e   :  { %2398 = vmatprep.subr.bf16.mxu0 %v3283_v35  ;;  %2441 = vmatprep.subr.bf16.mxu1 %v3286_v42 }
 0x3a1   :  { %2399 = vmatpush1.bf16.msra.mxu0 %v3281_v43  ;;  %2442 = vmatpush1.bf16.msra.mxu1 %v3284_v44  ;;  %v1466_v43 = vrot.slane %v1457_v41, %v3876_v8  ;;  %v1474_v44 = vrot.slane %v1457_v41, %v161_v36 }
 0x3a2   :  { %2400 = vmatprep.subr.bf16.mxu0 %v3289_v45  ;;  %2443 = vmatprep.subr.bf16.mxu1 %v3292_v46  ;;  %v1462_v45 = vrot.slane %v1457_v41, %v3879_v10  ;;  %v1470_v46 = vrot.slane %v1457_v41, %v3888_v37  ;;  %v3395_v41 = vld [vmem:[%s4397_s11 + $0x8] ss:$12 sps:$4 sm:$0xff]  }
 0x3a5   :  { %2401 = vmatpush1.bf16.msra.mxu0 %v3287_v47  ;;  %2444 = vmatpush1.bf16.msra.mxu1 %v3290_v48 }
 0x3a6   :  { %2402 = vmatprep.subr.bf16.mxu0 %v3295_v49  ;;  %2445 = vmatprep.subr.bf16.mxu1 %v3298_v50 }
 0x3a9   :  { %2403 = vmatpush1.bf16.msra.mxu0 %v3293_v51  ;;  %2446 = vmatpush1.bf16.msra.mxu1 %v3296_v52 }
 0x3aa   :  { %2404 = vmatprep.subr.bf16.mxu0 %v3301_v53  ;;  %2447 = vmatprep.subr.bf16.mxu1 %v3304_v54 }
 0x3ad   :  { %2405 = vmatpush1.bf16.msra.mxu0 %v3299_v55  ;;  %2448 = vmatpush1.bf16.msra.mxu1 %v3302_v56 }
 0x3ae   :  { %2406 = vmatprep.subr.bf16.mxu0 %v3307_v57  ;;  %2449 = vmatprep.subr.bf16.mxu1 %v3310_v58 }
 0x3b1   :  { %2407 = vmatpush1.bf16.msra.mxu0 %v3305_v59  ;;  %2450 = vmatpush1.bf16.msra.mxu1 %v3308_v60 }
 0x3b2   :  { %2408 = vmatprep.subr.bf16.mxu0 %v3313_v61  ;;  %2451 = vmatprep.subr.bf16.mxu1 %v3316_v62 }
 0x3b5   :  { %2409 = vmatpush1.bf16.msra.mxu0 %v3311_v63  ;;  %2452 = vmatpush1.bf16.msra.mxu1 %v3314_v0 }
 0x3b6   :  { %2410 = vmatprep.subr.bf16.mxu0 %v3319_v2  ;;  %2453 = vmatprep.subr.bf16.mxu1 %v3322_v3 }
 0x3b9   :  { %2411 = vmatpush2.bf16.msra.mxu0 %v3317_v4  ;;  %2454 = vmatpush2.bf16.msra.mxu1 %v3320_v5 }
 0x3ba   :  { %2412 = vmatprep.subr.bf16.mxu0 %v3325_v1  ;;  %2455 = vmatprep.subr.bf16.mxu1 %v3328_v6  ;;  %v3367_v1 = vld [vmem:[%s4397_s11 + $0xb0] ss:$12 sps:$4 sm:$0xff]  }
 0x3bb   :  { %v3368_v6 = vld [vmem:[%s4397_s11 + $0x230] ss:$12 sps:$4 sm:$0xff]  }
 0x3bd   :  { %2413 = vmatpush2.bf16.msra.mxu0 %v3323_v9  ;;  %2456 = vmatpush2.bf16.msra.mxu1 %v3326_v11 }
 0x3be   :  { %2414 = vmatprep.subr.bf16.mxu0 %v3331_v12  ;;  %2457 = vmatprep.subr.bf16.mxu1 %v3334_v13  ;;  %v3369_v12 = vld [vmem:[%s4397_s11 + $0x158] ss:$12 sps:$4 sm:$0xff]  }
 0x3bf   :  { %v3370_v13 = vld [vmem:[%s4397_s11 + $0x2d8] ss:$12 sps:$4 sm:$0xff]  }
 0x3c1   :  { %2415 = vmatpush2.bf16.msra.mxu0 %v3329_v14  ;;  %2458 = vmatpush2.bf16.msra.mxu1 %v3332_v15  ;;  %v3371_v14 = vld [vmem:[%s4397_s11 + $0x98] ss:$12 sps:$4 sm:$0xff]  }
 0x3c2   :  { %2416 = vmatprep.subr.bf16.mxu0 %v3337_v16  ;;  %2459 = vmatprep.subr.bf16.mxu1 %v3340_v17  ;;  %v3372_v15 = vld [vmem:[%s4397_s11 + $0x218] ss:$12 sps:$4 sm:$0xff]   ;;  %v3373_v16 = vld [vmem:[%s4397_s11 + $0x140] ss:$12 sps:$4 sm:$0xff]  }
 0x3c3   :  { %v3374_v17 = vld [vmem:[%s4397_s11 + $0x2c0] ss:$12 sps:$4 sm:$0xff]  }
 0x3c5   :  { %2417 = vmatpush2.bf16.msra.mxu0 %v3335_v18  ;;  %2460 = vmatpush2.bf16.msra.mxu1 %v3338_v19  ;;  %v3375_v18 = vld [vmem:[%s4397_s11 + $0x80] ss:$12 sps:$4 sm:$0xff]  }
 0x3c6   :  { %2418 = vmatprep.subr.bf16.mxu0 %v3343_v20  ;;  %2461 = vmatprep.subr.bf16.mxu1 %v3346_v21  ;;  %v3376_v19 = vld [vmem:[%s4397_s11 + $0x200] ss:$12 sps:$4 sm:$0xff]   ;;  %v3377_v20 = vld [vmem:[%s4397_s11 + $0x128] ss:$12 sps:$4 sm:$0xff]  }
 0x3c7   :  { %v3378_v21 = vld [vmem:[%s4397_s11 + $0x2a8] ss:$12 sps:$4 sm:$0xff]  }
 0x3c9   :  { %2419 = vmatpush2.bf16.msra.mxu0 %v3341_v22  ;;  %2462 = vmatpush2.bf16.msra.mxu1 %v3344_v23  ;;  %v3379_v22 = vld [vmem:[%s4397_s11 + $0x68] ss:$12 sps:$4 sm:$0xff]  }
 0x3ca   :  { %2420 = vmatprep.subr.bf16.mxu0 %v3349_v24  ;;  %2463 = vmatprep.subr.bf16.mxu1 %v3352_v25  ;;  %v3380_v23 = vld [vmem:[%s4397_s11 + $0x1e8] ss:$12 sps:$4 sm:$0xff]   ;;  %v3381_v24 = vld [vmem:[%s4397_s11 + $0x110] ss:$12 sps:$4 sm:$0xff]  }
 0x3cb   :  { %v3382_v25 = vld [vmem:[%s4397_s11 + $0x290] ss:$12 sps:$4 sm:$0xff]  }
 0x3cd   :  { %2421 = vmatpush2.bf16.msra.mxu0 %v3347_v26  ;;  %2464 = vmatpush2.bf16.msra.mxu1 %v3350_v27  ;;  %v3383_v26 = vld [vmem:[%s4397_s11 + $0x50] ss:$12 sps:$4 sm:$0xff]  }
 0x3ce   :  { %2422 = vmatprep.subr.bf16.mxu0 %v3355_v28  ;;  %2465 = vmatprep.subr.bf16.mxu1 %v3358_v29  ;;  %v3384_v27 = vld [vmem:[%s4397_s11 + $0x1d0] ss:$12 sps:$4 sm:$0xff]   ;;  %v3385_v28 = vld [vmem:[%s4397_s11 + $0xf8] ss:$12 sps:$4 sm:$0xff]  }
 0x3cf   :  { %v3386_v29 = vld [vmem:[%s4397_s11 + $0x278] ss:$12 sps:$4 sm:$0xff]  }
 0x3d1   :  { %2423 = vmatpush2.bf16.msra.mxu0 %v3353_v30  ;;  %2466 = vmatpush2.bf16.msra.mxu1 %v3356_v31  ;;  %v3387_v30 = vld [vmem:[%s4397_s11 + $0x38] ss:$12 sps:$4 sm:$0xff]  }
 0x3d2   :  { %2424 = vmatprep.subr.bf16.mxu0 %v3361_v32  ;;  %2467 = vmatprep.subr.bf16.mxu1 %v3364_v33  ;;  %v3388_v31 = vld [vmem:[%s4397_s11 + $0x1b8] ss:$12 sps:$4 sm:$0xff]   ;;  %v3389_v32 = vld [vmem:[%s4397_s11 + $0xe0] ss:$12 sps:$4 sm:$0xff]  }
 0x3d3   :  { %v3390_v33 = vld [vmem:[%s4397_s11 + $0x260] ss:$12 sps:$4 sm:$0xff]  }
 0x3d5   :  { %2425 = vmatpush2.bf16.msra.mxu0 %v3359_v34  ;;  %2468 = vmatpush2.bf16.msra.mxu1 %v3362_v38  ;;  %v3391_v34 = vld [vmem:[%s4397_s11 + $0x20] ss:$12 sps:$4 sm:$0xff]  }
 0x3d6   :  { %2938 = vmatprep.subr.bf16.mxu0 %v3365_v39  ;;  %2960 = vmatprep.subr.bf16.mxu1 %v3366_v40  ;;  %v3392_v38 = vld [vmem:[%s4397_s11 + $0x1a0] ss:$12 sps:$4 sm:$0xff]   ;;  %v3393_v39 = vld [vmem:[%s4397_s11 + $0xc8] ss:$12 sps:$4 sm:$0xff]  }
 0x3d7   :  { %v3394_v40 = vld [vmem:[%s4397_s11 + $0x248] ss:$12 sps:$4 sm:$0xff]  }
 0x458   :  { %v1673_v35 = vpop.f32.mrf.mxu0  ;;  %v1716_v42 = vpop.f32.mrf.mxu1 }
 0x459   :  { %v1674_v55 = vadd.f32 %v1673_v35, %v1462_v45  ;;  %v1717_v56 = vadd.f32 %v1716_v42, %v1470_v46  ;;  %v3396_v35 = vld [vmem:[%s4397_s11 + $0x188] ss:$12 sps:$4 sm:$0xff]   ;;  %v1865_v42 = vld [vmem:[%s4400_s12] sm:$0x7] }
 0x45a   :  { %v1675_v47 = vpop.f32.mrf.mxu0  ;;  %v1718_v48 = vpop.f32.mrf.mxu1 }
 0x45b   :  { %v1676_v51 = vadd.f32 %v1675_v47, %v1466_v43  ;;  %v1719_v52 = vadd.f32 %v1718_v48, %v1474_v44  ;;  %v1725_v2 = vmax.f32 %v1674_v55, 0.0  ;;  %v1727_v3 = vmax.f32 %v1717_v56, 0.0 }
 0x45c   :  { %v1677_v49 = vpop.f32.mrf.mxu0  ;;  %v1720_v50 = vpop.f32.mrf.mxu1 }
 0x45d   :  { %v1678_v53 = vadd.f32 %v1677_v49, %v1462_v45  ;;  %v1721_v54 = vadd.f32 %v1720_v50, %v1470_v46  ;;  %v1726_v61 = vmax.f32 %v1676_v51, 0.0  ;;  %v1728_v62 = vmax.f32 %v1719_v52, 0.0 }
 0x45e   :  { %v1679_v57 = vpop.f32.mrf.mxu0  ;;  %v1722_v58 = vpop.f32.mrf.mxu1 }
 0x45f   :  { %v1680_v59 = vadd.f32 %v1679_v57, %v1466_v43  ;;  %v1723_v60 = vadd.f32 %v1722_v58, %v1474_v44  ;;  %v1729_v7 = vmax.f32 %v1678_v53, 0.0  ;;  %v1731_v36 = vmax.f32 %v1721_v54, 0.0 }
 0x460   :  { %v1870_v43 = vrot.slane %v1865_v42, %v3879_v10  ;;  %v1874_v44 = vrot.slane %v1865_v42, %v3876_v8 }
 0x461   :  { %v1730_v63 = vmax.f32 %v1680_v59, 0.0  ;;  %v1732_v0 = vmax.f32 %v1723_v60, 0.0  ;;  %v4278_v9 = vpack.c.bf16 %v1729_v7, %v1725_v2  ;;  %v4280_v11 = vpack.c.bf16 %v1731_v36, %v1727_v3 }
 0x463   :  { %v1734_v4 = vpack.c.bf16 %v1730_v63, %v1726_v61  ;;  %v1736_v5 = vpack.c.bf16 %v1732_v0, %v1728_v62  ;;  %v1878_v61 = vrot.slane %v1865_v42, %v3888_v37 }
 0x465   :  { %2426 = vmatprep.mubr.bf16.mxu0 %v1734_v4  ;;  %2469 = vmatprep.mubr.bf16.mxu1 %v1736_v5 }
 0x466   :  { %2427 = vmatmul.mubr.bf16.vlgmr.msra.gmra.mxu0 %v4278_v9  ;;  %2470 = vmatmul.mubr.bf16.vlgmr.msra.gmra.mxu1 %v4280_v11 }
 0x467   :  { %2939 = vmatpush3.bf16.msra.mxu0 %v3367_v1  ;;  %2961 = vmatpush3.bf16.msra.mxu1 %v3368_v6 }
 0x468   :  { %2512 = vmatprep.mubr.bf16.mxu0 %v1734_v4  ;;  %2553 = vmatprep.mubr.bf16.mxu1 %v1736_v5 }
 0x469   :  { %2940 = vmatprep.subr.bf16.mxu0 %v3369_v12  ;;  %2962 = vmatprep.subr.bf16.mxu1 %v3370_v13 }
 0x46b   :  { %2941 = vmatpush3.bf16.msra.mxu0 %v3371_v14  ;;  %2963 = vmatpush3.bf16.msra.mxu1 %v3372_v15 }
 0x46c   :  { %2942 = vmatprep.subr.bf16.mxu0 %v3373_v16  ;;  %2964 = vmatprep.subr.bf16.mxu1 %v3374_v17 }
 0x46f   :  { %2943 = vmatpush3.bf16.msra.mxu0 %v3375_v18  ;;  %2965 = vmatpush3.bf16.msra.mxu1 %v3376_v19 }
 0x470   :  { %2944 = vmatprep.subr.bf16.mxu0 %v3377_v20  ;;  %2966 = vmatprep.subr.bf16.mxu1 %v3378_v21 }
 0x473   :  { %2945 = vmatpush3.bf16.msra.mxu0 %v3379_v22  ;;  %2967 = vmatpush3.bf16.msra.mxu1 %v3380_v23 }
 0x474   :  { %2946 = vmatprep.subr.bf16.mxu0 %v3381_v24  ;;  %2968 = vmatprep.subr.bf16.mxu1 %v3382_v25 }
 0x477   :  { %2947 = vmatpush3.bf16.msra.mxu0 %v3383_v26  ;;  %2969 = vmatpush3.bf16.msra.mxu1 %v3384_v27 }
 0x478   :  { %2948 = vmatprep.subr.bf16.mxu0 %v3385_v28  ;;  %2970 = vmatprep.subr.bf16.mxu1 %v3386_v29 }
 0x47b   :  { %2949 = vmatpush3.bf16.msra.mxu0 %v3387_v30  ;;  %2971 = vmatpush3.bf16.msra.mxu1 %v3388_v31 }
 0x47c   :  { %2950 = vmatprep.subr.bf16.mxu0 %v3389_v32  ;;  %2972 = vmatprep.subr.bf16.mxu1 %v3390_v33 }
 0x47f   :  { %2951 = vmatpush3.bf16.msra.mxu0 %v3391_v34  ;;  %2973 = vmatpush3.bf16.msra.mxu1 %v3392_v38 }
 0x480   :  { %2952 = vmatprep.subr.bf16.mxu0 %v3393_v39  ;;  %2974 = vmatprep.subr.bf16.mxu1 %v3394_v40 }
 0x483   :  { %2953 = vmatpush3.bf16.msra.mxu0 %v3395_v41  ;;  %2975 = vmatpush3.bf16.msra.mxu1 %v3396_v35 }
 0x486   :  { %2513 = vmatmul.mubr.bf16.vlgmr.msra.gmra.mxu0 %v4278_v9  ;;  %2554 = vmatmul.mubr.bf16.vlgmr.msra.gmra.mxu1 %v4280_v11 }
 0x526   :  { %v2428_v45 = vpop.f32.mrf.mxu0  ;;  %v2471_v46 = vpop.f32.mrf.mxu1 }
 0x527   :  { %v2429_v47 = vadd.f32 %v2428_v45, %v1870_v43 }
 0x528   :  { %v2430_v48 = vpop.f32.mrf.mxu0  ;;  %v2473_v49 = vpop.f32.mrf.mxu1 }
 0x529   :  { %v2431_v50 = vadd.f32 %v2430_v48, %v1874_v44  ;;  %v2472_v53 = vadd.f32 %v2471_v46, %v2429_v47 }
 0x52a   :  { %v2432_v51 = vpop.f32.mrf.mxu0  ;;  %v2475_v52 = vpop.f32.mrf.mxu1 }
 0x52b   :  { %v2474_v54 = vadd.f32 %v2473_v49, %v2431_v50  ;;  %v2433_v55 = vadd.f32 %v2432_v51, %v1870_v43 }
 0x52c   :  { %v2434_v56 = vpop.f32.mrf.mxu0  ;;  %v2477_v59 = vpop.f32.mrf.mxu1 }
 0x52d   :  { %v2872_v57 = vpack.c.bf16 %v2474_v54, %v2472_v53  ;;  %v2435_v58 = vadd.f32 %v2434_v56, %v1874_v44  ;;  %v2476_v8 = vadd.f32 %v2475_v52, %v2433_v55 }
 0x52f   :  { %2582 = vst [vmem:[%s4401_s13] sm:$0xff] %v2872_v57  ;;  %v2478_v10 = vadd.f32 %v2477_v59, %v2435_v58 }
 0x531   :  { %v2874_v60 = vpack.c.bf16 %v2478_v10, %v2476_v8 }
 0x533   :  { %2584 = vst [vmem:[%s4401_s13 + $0xc] sm:$0xff] %v2874_v60 }
 0x546   :  { %v2954_v7 = vpop.f32.mrf.mxu0  ;;  %v2976_v36 = vpop.f32.mrf.mxu1 }
 0x548   :  { %v2955_v62 = vpop.f32.mrf.mxu0  ;;  %v2977_v63 = vpop.f32.mrf.mxu1 }
 0x549   :  { %v2956_v0 = vadd.f32 %v2955_v62, %v2954_v7  ;;  %v2978_v5 = vadd.f32 %v2977_v63, %v2976_v36 }
 0x54a   :  { %v2957_v2 = vpop.f32.mrf.mxu0  ;;  %v2979_v3 = vpop.f32.mrf.mxu1 }
 0x54b   :  { %v2515_v4 = vadd.f32 %v2956_v0, %v1878_v61 }
 0x54c   :  { %v2958_v1 = vpop.f32.mrf.mxu0  ;;  %v2980_v6 = vpop.f32.mrf.mxu1 }
 0x54d   :  { %v2556_v9 = vadd.f32 %v2978_v5, %v2515_v4  ;;  %v2959_v11 = vadd.f32 %v2958_v1, %v2957_v2  ;;  %v2981_v14 = vadd.f32 %v2980_v6, %v2979_v3 }
 0x54f   :  { %v2873_v12 = vpack.c.bf16 %v2556_v9, %v2556_v9  ;;  %v2518_v13 = vadd.f32 %v2959_v11, %v1878_v61 }
 0x551   :  { %2583 = vst [vmem:[%s4401_s13 + $0x8] sm:$0xf] %v2873_v12  ;;  %v2559_v15 = vadd.f32 %v2981_v14, %v2518_v13 }
 0x553   :  { %v2875_v37 = vpack.c.bf16 %v2559_v15, %v2559_v15 }
 0x555   :  { %2585 = vst [vmem:[%s4401_s13 + $0x14] sm:$0xf] %v2875_v37 }

</bundles_post_ra>
